<compile_context>
chip_gen: v5e
topology: v5e:2x2
jax: 0.10.0
libtpu: 0.0.40
codegen_flags: <defaults>
</compile_context>

<pallas_src>
import functools
import math

import jax
import jax.numpy as jnp
from jax.experimental import pallas as pl
from jax.experimental.pallas import tpu as pltpu


# ---------------------------------------------------------------------------
# Fused Pallas kernel: 3 conv layers + SiLU, one batch-tile per grid step
# ---------------------------------------------------------------------------
def _fused_melody_kernel(x_ref, w1_ref, b1_ref, w2_ref, b2_ref, w3_ref, b3_ref,
                         o_ref, *, L1, L2, compute_dtype):
    # x_ref  : (TB, C0, L)        input block, NCW (channels-first) straight from HBM
    # w*_ref : (3*C_in, C_out)    taps flattened tap-major along rows, compute dtype
    # b*_ref : (1, C_out)         float32
    # o_ref  : (TB, C3, L3)       output block, NCW
    TB, C0, L = x_ref.shape
    C1 = b1_ref.shape[-1]
    C2 = b2_ref.shape[-1]
    C3 = b3_ref.shape[-1]
    L3 = L2
    cdt = compute_dtype
    f32 = jnp.float32

    w1 = w1_ref[...]                                     # (3*C0, C1)
    w2 = w2_ref[...]                                     # (3*C1, C2)
    w3 = w3_ref[...]                                     # (3*C2, C3)

    # ---- NCW -> NLC transpose in VMEM (no HBM round trip), cast to bf16 ----
    x = jnp.transpose(x_ref[...].astype(cdt), (0, 2, 1))  # (TB, L, C0)

    # Pad time to Lp = 2*(L1+1) (>= L; the extra zero row is never read as a tap).
    Lp = 2 * (L1 + 1)
    if Lp > L:
        x = jnp.concatenate([x, jnp.zeros((TB, Lp - L, C0), cdt)], axis=1)
    # Paired-lane view: row j = [x[2j] | x[2j+1]]  -> stride-2 taps become
    # contiguous slices (no sublane-stride-2 gathers).
    xp = x.reshape(TB, Lp // 2, 2 * C0)                   # (TB, Lp/2, 2*C0)

    # ---- layer 1: Conv1d(C0 -> C1, k=3, s=2, p=0) + SiLU -------------------
    lhs01 = xp[:, 0:L1, :].reshape(TB * L1, 2 * C0)        # taps 0,1
    lhs2 = xp[:, 1:L1 + 1, 0:C0].reshape(TB * L1, C0)      # tap 2
    a1 = jnp.dot(lhs01, w1[0:2 * C0, :], preferred_element_type=f32)
    a1 = a1 + jnp.dot(lhs2, w1[2 * C0:, :], preferred_element_type=f32)
    a1 = a1 + b1_ref[...]
    a1 = a1 * jax.nn.sigmoid(a1)                           # SiLU, f32 epilogue
    h1 = a1.astype(cdt).reshape(TB, L1, C1)

    # ---- layer 2: Conv1d(C1 -> C2, k=3, s=2, p=1) + SiLU -------------------
    Lp2 = 2 * (L2 + 1)
    n_r = Lp2 - 1 - L1                                     # 1 or 2 right zero rows
    h1p = jnp.concatenate(
        [jnp.zeros((TB, 1, C1), cdt), h1, jnp.zeros((TB, n_r, C1), cdt)], axis=1)
    h1pp = h1p.reshape(TB, Lp2 // 2, 2 * C1)               # paired rows of padded h1
    lhs01 = h1pp[:, 0:L2, :].reshape(TB * L2, 2 * C1)
    lhs2 = h1pp[:, 1:L2 + 1, 0:C1].reshape(TB * L2, C1)
    a2 = jnp.dot(lhs01, w2[0:2 * C1, :], preferred_element_type=f32)
    a2 = a2 + jnp.dot(lhs2, w2[2 * C1:, :], preferred_element_type=f32)
    a2 = a2 + b2_ref[...]
    a2 = a2 * jax.nn.sigmoid(a2)
    h2 = a2.astype(cdt).reshape(TB, L2, C2)

    # ---- layer 3: Conv1d(C2 -> C3, k=3, s=1, p=1), no activation ------------
    zero2 = jnp.zeros((TB, 1, C2), cdt)
    h2p = jnp.concatenate([zero2, h2, zero2], axis=1)      # (TB, L2+2, C2)
    a3 = jnp.dot(h2p[:, 0:L3, :].reshape(TB * L3, C2), w3[0:C2, :],
                 preferred_element_type=f32)
    a3 = a3 + jnp.dot(h2p[:, 1:L3 + 1, :].reshape(TB * L3, C2), w3[C2:2 * C2, :],
                      preferred_element_type=f32)
    a3 = a3 + jnp.dot(h2p[:, 2:L3 + 2, :].reshape(TB * L3, C2), w3[2 * C2:, :],
                      preferred_element_type=f32)
    a3 = a3 + b3_ref[...]

    # ---- NLC -> NCW transpose in VMEM, store NCW output --------------------
    out = a3.reshape(TB, L3, C3)
    o_ref[...] = jnp.transpose(out, (0, 2, 1)).astype(o_ref.dtype)


# ---------------------------------------------------------------------------
# Wrapper (NCW in / NCW out, matching the PyTorch module; no wrapper transposes)
# ---------------------------------------------------------------------------
def _flatten_weight(w_oik, dtype):
    # PyTorch Conv1d weight (C_out, C_in, K) -> (K*C_in, C_out), tap-major rows.
    k_ci_co = jnp.transpose(w_oik, (2, 1, 0))              # (K, C_in, C_out)
    K, C_in, C_out = k_ci_co.shape
    return k_ci_co.reshape(K * C_in, C_out).astype(dtype)


def _pick_batch_tile(B, L, L3):
    # Smallest divisor of B giving MXU M = TB*L3 >= ~256, bounded so the f32
    # input block stays well under VMEM (<= ~8 MiB per buffer).
    max_by_vmem = max(1, (8 << 20) // max(1, 128 * L * 4))
    max_tb = max(1, min(8, max_by_vmem, B))
    tile = 1
    for tb in range(1, max_tb + 1):
        if B % tb == 0:
            tile = tb
            if tb * L3 >= 256:
                break
    return tile


def melody_extractor_forward(x_ncl, params, *, compute_dtype=jnp.bfloat16,
                             batch_tile=None):
    """Forward pass of melody_extractor. x_ncl: (B, 128, L) float32, NCW layout."""
    B, C0, L = x_ncl.shape
    assert C0 == 128 and L >= 3, (C0, L)

    w1, b1 = params["conv1"]
    w2, b2 = params["conv2"]
    w3, b3 = params["conv3"]
    C1, C2, C3 = w1.shape[0], w2.shape[0], w3.shape[0]     # 128, 192, 192

    # PyTorch Conv1d output-length formulas.
    L1 = (L - 3) // 2 + 1            # k=3, s=2, p=0
    L2 = (L1 - 1) // 2 + 1           # k=3, s=2, p=1
    L3 = L2                          # k=3, s=1, p=1

    if batch_tile is None:
        batch_tile = _pick_batch_tile(B, L, L3)
    TB = batch_tile
    assert B % TB == 0, (B, TB)

    w1f = _flatten_weight(w1, compute_dtype)               # (3*C0, C1)
    w2f = _flatten_weight(w2, compute_dtype)               # (3*C1, C2)
    w3f = _flatten_weight(w3, compute_dtype)               # (3*C2, C3)
    b1r = b1.reshape(1, C1).astype(jnp.float32)
    b2r = b2.reshape(1, C2).astype(jnp.float32)
    b3r = b3.reshape(1, C3).astype(jnp.float32)

    kernel = functools.partial(_fused_melody_kernel, L1=L1, L2=L2,
                               compute_dtype=compute_dtype)

    out = pl.pallas_call(
        kernel,
        out_shape=jax.ShapeDtypeStruct((B, C3, L3), jnp.float32),
        grid=(B // TB,),
        in_specs=[
            pl.BlockSpec((TB, C0, L), lambda b: (b, 0, 0)),        # NCW input tile
            pl.BlockSpec((3 * C0, C1), lambda b: (0, 0)),
            pl.BlockSpec((1, C1), lambda b: (0, 0)),
            pl.BlockSpec((3 * C1, C2), lambda b: (0, 0)),
            pl.BlockSpec((1, C2), lambda b: (0, 0)),
            pl.BlockSpec((3 * C2, C3), lambda b: (0, 0)),
            pl.BlockSpec((1, C3), lambda b: (0, 0)),
        ],
        out_specs=pl.BlockSpec((TB, C3, L3), lambda b: (b, 0, 0)),  # NCW output tile
        compiler_params=pltpu.CompilerParams(
            dimension_semantics=("parallel",),
            vmem_limit_bytes=64 * 1024 * 1024),
    )(x_ncl, w1f, b1r, w2f, b2r, w3f, b3r)

    return out                                              # already (B, C3, L3) NCW


# ---------------------------------------------------------------------------
# Parameter init (deterministic, mimics PyTorch Conv1d default uniform init)
# ---------------------------------------------------------------------------
def _init_conv(key, c_out, c_in, k):
    kw, kb = jax.random.split(key)
    bound = 1.0 / math.sqrt(c_in * k)
    w = jax.random.uniform(kw, (c_out, c_in, k), jnp.float32, -bound, bound)
    b = jax.random.uniform(kb, (c_out,), jnp.float32, -bound, bound)
    return w, b


def init_melody_extractor_params(key):
    k1, k2, k3 = jax.random.split(key, 3)
    return {
        "conv1": _init_conv(k1, 128, 128, 3),   # (C_out, C_in, K) PyTorch layout
        "conv2": _init_conv(k2, 192, 128, 3),
        "conv3": _init_conv(k3, 192, 192, 3),
    }


# ---------------------------------------------------------------------------
# Pure-JAX reference for correctness check
# ---------------------------------------------------------------------------
def _ref_conv1d(x_ncl, w_oik, b, stride, padding):
    y = jax.lax.conv_general_dilated(
        x_ncl, w_oik, window_strides=(stride,), padding=[(padding, padding)],
        dimension_numbers=("NCH", "OIH", "NCH"),
        precision=jax.lax.Precision.HIGHEST)
    return y + b[None, :, None]


def melody_extractor_ref(x_ncl, params):
    w1, b1 = params["conv1"]
    w2, b2 = params["conv2"]
    w3, b3 = params["conv3"]
    x = _ref_conv1d(x_ncl, w1, b1, 2, 0)
    x = x * jax.nn.sigmoid(x)
    x = _ref_conv1d(x, w2, b2, 2, 1)
    x = x * jax.nn.sigmoid(x)
    x = _ref_conv1d(x, w3, b3, 1, 1)
    return x


if __name__ == "__main__":
    key = jax.random.PRNGKey(0)
    k_x, k_p = jax.random.split(key)
    params = init_melody_extractor_params(k_p)

    # Shapes implied by the module: 128 input channels, small batch / length.
    B, C, L = 2, 128, 16
    x = jax.random.normal(k_x, (B, C, L), jnp.float32)
    ref = jax.block_until_ready(melody_extractor_ref(x, params))

    # bf16-MXU fast path (loose tolerance appropriate for bf16 matmul operands).
    out_bf16 = jax.block_until_ready(melody_extractor_forward(x, params))
    assert out_bf16.shape == ref.shape, (out_bf16.shape, ref.shape)
    assert jnp.allclose(out_bf16, ref, rtol=3e-2, atol=3e-2), (
        float(jnp.max(jnp.abs(out_bf16 - ref))))

    # f32 path: tight structural check of taps / strides / padding / bias / SiLU.
    out_f32 = jax.block_until_ready(
        melody_extractor_forward(x, params, compute_dtype=jnp.float32))
    assert jnp.allclose(out_f32, ref, rtol=1e-3, atol=1e-3), (
        float(jnp.max(jnp.abs(out_f32 - ref))))

    # Odd length + batch tile > 1: exercises the paired-lane tap alignment and
    # the multi-batch-per-step (fused-M) path.
    x2 = jax.random.normal(jax.random.fold_in(k_x, 1), (3, 128, 33), jnp.float32)
    ref2 = jax.block_until_ready(melody_extractor_ref(x2, params))
    out2 = jax.block_until_ready(melody_extractor_forward(x2, params))
    assert out2.shape == ref2.shape, (out2.shape, ref2.shape)
    assert jnp.allclose(out2, ref2, rtol=3e-2, atol=3e-2), (
        float(jnp.max(jnp.abs(out2 - ref2))))

    print("KERNEL_OK")
</pallas_src>

<mosaic_0001>
module attributes {stable_mosaic.version = 11 : i64} {
  func.func @_fused_melody_kernel(%arg0: i32, %arg1: memref<2x128x16xf32, #tpu.memory_space<vmem>>, %arg2: memref<384x128xbf16, #tpu.memory_space<vmem>>, %arg3: memref<1x128xf32, #tpu.memory_space<vmem>>, %arg4: memref<384x192xbf16, #tpu.memory_space<vmem>>, %arg5: memref<1x192xf32, #tpu.memory_space<vmem>>, %arg6: memref<576x192xbf16, #tpu.memory_space<vmem>>, %arg7: memref<1x192xf32, #tpu.memory_space<vmem>>, %arg8: memref<2x192x4xf32, #tpu.memory_space<vmem>>) attributes {dimension_semantics = [#tpu.dimension_semantics<parallel>], iteration_bounds = array<i64: 1>, scalar_prefetch = 0 : i64, scratch_operands = 0 : i64, tpu.core_type = #tpu.core_type<tc>, window_params = [{transform_indices = @transform_0, window_bounds = array<i64: 2, 128, 16>}, {pipeline_mode = #tpu.pipeline_mode<synchronous>, transform_indices = @transform_1, window_bounds = array<i64: 384, 128>}, {pipeline_mode = #tpu.pipeline_mode<synchronous>, transform_indices = @transform_2, window_bounds = array<i64: 1, 128>}, {pipeline_mode = #tpu.pipeline_mode<synchronous>, transform_indices = @transform_3, window_bounds = array<i64: 384, 192>}, {pipeline_mode = #tpu.pipeline_mode<synchronous>, transform_indices = @transform_4, window_bounds = array<i64: 1, 192>}, {pipeline_mode = #tpu.pipeline_mode<synchronous>, transform_indices = @transform_5, window_bounds = array<i64: 576, 192>}, {pipeline_mode = #tpu.pipeline_mode<synchronous>, transform_indices = @transform_6, window_bounds = array<i64: 1, 192>}, {transform_indices = @transform_7, window_bounds = array<i64: 2, 192, 4>}]} {
    %c0 = arith.constant 0 : index
    %c0_0 = arith.constant 0 : index
    %0 = vector.load %arg2[%c0, %c0_0] : memref<384x128xbf16, #tpu.memory_space<vmem>>, vector<384x128xbf16>
    %c0_1 = arith.constant 0 : index
    %c0_2 = arith.constant 0 : index
    %1 = vector.load %arg4[%c0_1, %c0_2] : memref<384x192xbf16, #tpu.memory_space<vmem>>, vector<384x192xbf16>
    %c0_3 = arith.constant 0 : index
    %c0_4 = arith.constant 0 : index
    %2 = vector.load %arg6[%c0_3, %c0_4] : memref<576x192xbf16, #tpu.memory_space<vmem>>, vector<576x192xbf16>
    %c0_5 = arith.constant 0 : index
    %c0_6 = arith.constant 0 : index
    %c0_7 = arith.constant 0 : index
    %3 = vector.load %arg1[%c0_5, %c0_6, %c0_7] : memref<2x128x16xf32, #tpu.memory_space<vmem>>, vector<2x128x16xf32>
    %4 = arith.truncf %3 : vector<2x128x16xf32> to vector<2x128x16xbf16>
    %5 = tpu.transpose %4, [0, 2, 1] : vector<2x128x16xbf16> -> vector<2x16x128xbf16>
    %6 = vector.shape_cast %5 : vector<2x16x128xbf16> to vector<2x8x256xbf16>
    %7 = vector.extract_strided_slice %6 {offsets = [0, 0, 0], sizes = [2, 7, 256], strides = [1, 1, 1]} : vector<2x8x256xbf16> to vector<2x7x256xbf16>
    %8 = vector.shape_cast %7 : vector<2x7x256xbf16> to vector<14x256xbf16>
    %9 = vector.extract_strided_slice %6 {offsets = [0, 1, 0], sizes = [2, 7, 128], strides = [1, 1, 1]} : vector<2x8x256xbf16> to vector<2x7x128xbf16>
    %10 = vector.shape_cast %9 : vector<2x7x128xbf16> to vector<14x128xbf16>
    %11 = vector.extract_strided_slice %0 {offsets = [0, 0], sizes = [256, 128], strides = [1, 1]} : vector<384x128xbf16> to vector<256x128xbf16>
    %cst = arith.constant dense<0.000000e+00> : vector<14x128xf32>
    %12 = tpu.matmul %8, %11, %cst {dimension_numbers = #tpu.dot_dimension_numbers<[1], [0], [0], [1], [0, 0, 1, 1], [], []>} : vector<14x256xbf16>, vector<256x128xbf16>, vector<14x128xf32> -> vector<14x128xf32>
    %13 = vector.extract_strided_slice %0 {offsets = [256, 0], sizes = [128, 128], strides = [1, 1]} : vector<384x128xbf16> to vector<128x128xbf16>
    %cst_8 = arith.constant dense<0.000000e+00> : vector<14x128xf32>
    %14 = tpu.matmul %10, %13, %cst_8 {dimension_numbers = #tpu.dot_dimension_numbers<[1], [0], [0], [1], [0, 0, 1, 1], [], []>} : vector<14x128xbf16>, vector<128x128xbf16>, vector<14x128xf32> -> vector<14x128xf32>
    %15 = arith.addf %12, %14 : vector<14x128xf32>
    %c0_9 = arith.constant 0 : index
    %c0_10 = arith.constant 0 : index
    %16 = vector.load %arg3[%c0_9, %c0_10] : memref<1x128xf32, #tpu.memory_space<vmem>>, vector<1x128xf32>
    %17 = vector.broadcast %16 : vector<1x128xf32> to vector<14x128xf32>
    %18 = arith.addf %15, %17 : vector<14x128xf32>
    %19 = arith.negf %18 : vector<14x128xf32>
    %20 = math.exp %19 : vector<14x128xf32>
    %cst_11 = arith.constant 1.000000e+00 : f32
    %21 = vector.broadcast %cst_11 : f32 to vector<14x128xf32>
    %22 = arith.addf %21, %20 : vector<14x128xf32>
    %23 = arith.divf %21, %22 : vector<14x128xf32>
    %24 = arith.mulf %18, %23 : vector<14x128xf32>
    %25 = arith.truncf %24 : vector<14x128xf32> to vector<14x128xbf16>
    %26 = vector.shape_cast %25 : vector<14x128xbf16> to vector<2x7x128xbf16>
    %cst_12 = arith.constant 0.000000e+00 : bf16
    %27 = vector.broadcast %cst_12 : bf16 to vector<2x1x128xbf16>
    %cst_13 = arith.constant 0.000000e+00 : bf16
    %28 = vector.broadcast %cst_13 : bf16 to vector<2x2x128xbf16>
    %29 = tpu.concatenate %27, %26, %28 in 1 : vector<2x1x128xbf16>, vector<2x7x128xbf16>, vector<2x2x128xbf16> -> vector<2x10x128xbf16>
    %30 = vector.shape_cast %29 : vector<2x10x128xbf16> to vector<2x5x256xbf16>
    %31 = vector.extract_strided_slice %30 {offsets = [0, 0, 0], sizes = [2, 4, 256], strides = [1, 1, 1]} : vector<2x5x256xbf16> to vector<2x4x256xbf16>
    %32 = vector.shape_cast %31 : vector<2x4x256xbf16> to vector<8x256xbf16>
    %33 = vector.extract_strided_slice %30 {offsets = [0, 1, 0], sizes = [2, 4, 128], strides = [1, 1, 1]} : vector<2x5x256xbf16> to vector<2x4x128xbf16>
    %34 = vector.shape_cast %33 : vector<2x4x128xbf16> to vector<8x128xbf16>
    %35 = vector.extract_strided_slice %1 {offsets = [0, 0], sizes = [256, 192], strides = [1, 1]} : vector<384x192xbf16> to vector<256x192xbf16>
    %cst_14 = arith.constant dense<0.000000e+00> : vector<8x192xf32>
    %36 = tpu.matmul %32, %35, %cst_14 {dimension_numbers = #tpu.dot_dimension_numbers<[1], [0], [0], [1], [0, 0, 1, 1], [], []>} : vector<8x256xbf16>, vector<256x192xbf16>, vector<8x192xf32> -> vector<8x192xf32>
    %37 = vector.extract_strided_slice %1 {offsets = [256, 0], sizes = [128, 192], strides = [1, 1]} : vector<384x192xbf16> to vector<128x192xbf16>
    %cst_15 = arith.constant dense<0.000000e+00> : vector<8x192xf32>
    %38 = tpu.matmul %34, %37, %cst_15 {dimension_numbers = #tpu.dot_dimension_numbers<[1], [0], [0], [1], [0, 0, 1, 1], [], []>} : vector<8x128xbf16>, vector<128x192xbf16>, vector<8x192xf32> -> vector<8x192xf32>
    %39 = arith.addf %36, %38 : vector<8x192xf32>
    %c0_16 = arith.constant 0 : index
    %c0_17 = arith.constant 0 : index
    %40 = vector.load %arg5[%c0_16, %c0_17] : memref<1x192xf32, #tpu.memory_space<vmem>>, vector<1x192xf32>
    %41 = vector.broadcast %40 : vector<1x192xf32> to vector<8x192xf32>
    %42 = arith.addf %39, %41 : vector<8x192xf32>
    %43 = arith.negf %42 : vector<8x192xf32>
    %44 = math.exp %43 : vector<8x192xf32>
    %cst_18 = arith.constant 1.000000e+00 : f32
    %45 = vector.broadcast %cst_18 : f32 to vector<8x192xf32>
    %46 = arith.addf %45, %44 : vector<8x192xf32>
    %47 = arith.divf %45, %46 : vector<8x192xf32>
    %48 = arith.mulf %42, %47 : vector<8x192xf32>
    %49 = arith.truncf %48 : vector<8x192xf32> to vector<8x192xbf16>
    %50 = vector.shape_cast %49 : vector<8x192xbf16> to vector<2x4x192xbf16>
    %cst_19 = arith.constant 0.000000e+00 : bf16
    %51 = vector.broadcast %cst_19 : bf16 to vector<2x1x192xbf16>
    %52 = tpu.concatenate %51, %50, %51 in 1 : vector<2x1x192xbf16>, vector<2x4x192xbf16>, vector<2x1x192xbf16> -> vector<2x6x192xbf16>
    %53 = vector.extract_strided_slice %52 {offsets = [0, 0, 0], sizes = [2, 4, 192], strides = [1, 1, 1]} : vector<2x6x192xbf16> to vector<2x4x192xbf16>
    %54 = vector.shape_cast %53 : vector<2x4x192xbf16> to vector<8x192xbf16>
    %55 = vector.extract_strided_slice %2 {offsets = [0, 0], sizes = [192, 192], strides = [1, 1]} : vector<576x192xbf16> to vector<192x192xbf16>
    %cst_20 = arith.constant dense<0.000000e+00> : vector<8x192xf32>
    %56 = tpu.matmul %54, %55, %cst_20 {dimension_numbers = #tpu.dot_dimension_numbers<[1], [0], [0], [1], [0, 0, 1, 1], [], []>} : vector<8x192xbf16>, vector<192x192xbf16>, vector<8x192xf32> -> vector<8x192xf32>
    %57 = vector.extract_strided_slice %52 {offsets = [0, 1, 0], sizes = [2, 4, 192], strides = [1, 1, 1]} : vector<2x6x192xbf16> to vector<2x4x192xbf16>
    %58 = vector.shape_cast %57 : vector<2x4x192xbf16> to vector<8x192xbf16>
    %59 = vector.extract_strided_slice %2 {offsets = [192, 0], sizes = [192, 192], strides = [1, 1]} : vector<576x192xbf16> to vector<192x192xbf16>
    %cst_21 = arith.constant dense<0.000000e+00> : vector<8x192xf32>
    %60 = tpu.matmul %58, %59, %cst_21 {dimension_numbers = #tpu.dot_dimension_numbers<[1], [0], [0], [1], [0, 0, 1, 1], [], []>} : vector<8x192xbf16>, vector<192x192xbf16>, vector<8x192xf32> -> vector<8x192xf32>
    %61 = arith.addf %56, %60 : vector<8x192xf32>
    %62 = vector.extract_strided_slice %52 {offsets = [0, 2, 0], sizes = [2, 4, 192], strides = [1, 1, 1]} : vector<2x6x192xbf16> to vector<2x4x192xbf16>
    %63 = vector.shape_cast %62 : vector<2x4x192xbf16> to vector<8x192xbf16>
    %64 = vector.extract_strided_slice %2 {offsets = [384, 0], sizes = [192, 192], strides = [1, 1]} : vector<576x192xbf16> to vector<192x192xbf16>
    %cst_22 = arith.constant dense<0.000000e+00> : vector<8x192xf32>
    %65 = tpu.matmul %63, %64, %cst_22 {dimension_numbers = #tpu.dot_dimension_numbers<[1], [0], [0], [1], [0, 0, 1, 1], [], []>} : vector<8x192xbf16>, vector<192x192xbf16>, vector<8x192xf32> -> vector<8x192xf32>
    %66 = arith.addf %61, %65 : vector<8x192xf32>
    %c0_23 = arith.constant 0 : index
    %c0_24 = arith.constant 0 : index
    %67 = vector.load %arg7[%c0_23, %c0_24] : memref<1x192xf32, #tpu.memory_space<vmem>>, vector<1x192xf32>
    %68 = vector.broadcast %67 : vector<1x192xf32> to vector<8x192xf32>
    %69 = arith.addf %66, %68 : vector<8x192xf32>
    %70 = vector.shape_cast %69 : vector<8x192xf32> to vector<2x4x192xf32>
    %71 = tpu.transpose %70, [0, 2, 1] : vector<2x4x192xf32> -> vector<2x192x4xf32>
    %c0_25 = arith.constant 0 : index
    %c0_26 = arith.constant 0 : index
    %c0_27 = arith.constant 0 : index
    %72 = vector.load %arg8[%c0_25, %c0_26, %c0_27] : memref<2x192x4xf32, #tpu.memory_space<vmem>>, vector<2x192x4xf32>
    tpu.vector_store %arg8[%c0_25, %c0_26, %c0_27], %71 {strides = array<i32>} : memref<2x192x4xf32, #tpu.memory_space<vmem>>, vector<2x192x4xf32>,
    return
  }
  func.func @transform_0(%arg0: i32) -> (i32, i32, i32) {
    %c0_i32 = arith.constant 0 : i32
    %c0_i32_0 = arith.constant 0 : i32
    %c0_i32_1 = arith.constant 0 : i32
    return %arg0, %c0_i32, %c0_i32_0 : i32, i32, i32
  }
  func.func @transform_1(%arg0: i32) -> (i32, i32) {
    %c0_i32 = arith.constant 0 : i32
    %c0_i32_0 = arith.constant 0 : i32
    %c0_i32_1 = arith.constant 0 : i32
    return %c0_i32, %c0_i32_0 : i32, i32
  }
  func.func @transform_2(%arg0: i32) -> (i32, i32) {
    %c0_i32 = arith.constant 0 : i32
    %c0_i32_0 = arith.constant 0 : i32
    %c0_i32_1 = arith.constant 0 : i32
    return %c0_i32, %c0_i32_0 : i32, i32
  }
  func.func @transform_3(%arg0: i32) -> (i32, i32) {
    %c0_i32 = arith.constant 0 : i32
    %c0_i32_0 = arith.constant 0 : i32
    %c0_i32_1 = arith.constant 0 : i32
    return %c0_i32, %c0_i32_0 : i32, i32
  }
  func.func @transform_4(%arg0: i32) -> (i32, i32) {
    %c0_i32 = arith.constant 0 : i32
    %c0_i32_0 = arith.constant 0 : i32
    %c0_i32_1 = arith.constant 0 : i32
    return %c0_i32, %c0_i32_0 : i32, i32
  }
  func.func @transform_5(%arg0: i32) -> (i32, i32) {
    %c0_i32 = arith.constant 0 : i32
    %c0_i32_0 = arith.constant 0 : i32
    %c0_i32_1 = arith.constant 0 : i32
    return %c0_i32, %c0_i32_0 : i32, i32
  }
  func.func @transform_6(%arg0: i32) -> (i32, i32) {
    %c0_i32 = arith.constant 0 : i32
    %c0_i32_0 = arith.constant 0 : i32
    %c0_i32_1 = arith.constant 0 : i32
    return %c0_i32, %c0_i32_0 : i32, i32
  }
  func.func @transform_7(%arg0: i32) -> (i32, i32, i32) {
    %c0_i32 = arith.constant 0 : i32
    %c0_i32_0 = arith.constant 0 : i32
    %c0_i32_1 = arith.constant 0 : i32
    return %arg0, %c0_i32, %c0_i32_0 : i32, i32, i32
  }
}

</mosaic_0001>

<bundles_post_ra>
// kernel: tpu_custom_call.1
= control target key start
LH: loop header
LB: loop body
LE: loop exit
PB: predicated region body
PF: predicated region fallthrough
CT: control target
= control target key end

     0   :  { %vm285_vm0 = vcmask 1040384   ;;  %vm290_vm1 = vcmask 1041409   ;;  %vm294_vm2 = vcmask 1042434   ;;  %vm298_vm3 = vcmask 1043459   ;;  %s4179_s0 = inlined_call_operand.vmem [shape: f32[2,128,16], index: 0, kind: input, shape index: {}]   ;;  %s4180_s1 = inlined_call_operand.vmem [shape: bf16[384,128], index: 1, kind: input, shape index: {}]   ;;  %s4181_s2 = inlined_call_operand.vmem [shape: f32[1,128], index: 2, kind: input, shape index: {}]   ;;  %s4182_s3 = inlined_call_operand.vmem [shape: bf16[384,192], index: 3, kind: input, shape index: {}]   ;;  %s4183_s4 = inlined_call_operand.vmem [shape: f32[1,192], index: 4, kind: input, shape index: {}]   ;;  %s4184_s5 = inlined_call_operand.vmem [shape: bf16[576,192], index: 5, kind: input, shape index: {}]   ;;  %s4185_s6 = inlined_call_operand.vmem [shape: f32[1,192], index: 6, kind: input, shape index: {}]   ;;  %s4186_s7 = inlined_call_operand.vmem [shape: f32[2,192,4], index: 7, kind: output, shape index: {}]  }
   0x1   :  { %v195_v0 = vld [vmem:[%s4179_s0] sm:$0xff]  ;;  %v196_v1 = vld [vmem:[%s4179_s0 + $0x8] sm:$0xff]  ;;  %v197_v6 = vld [vmem:[%s4179_s0 + $0x10] sm:$0xff]  ;;  %vm698_vm12 = vsmask.f32 256  ;;  %vm702_vm14 = vcmask 1043456  }
   0x2   :  { %v211_v2 = vld [vmem:[%s4179_s0 + $0x80] sm:$0xff]  ;;  %v212_v3 = vld [vmem:[%s4179_s0 + $0x88] sm:$0xff]  ;;  %v227_v4 = vpack.c.bf16 %v196_v1, %v195_v0  ;;  %v198_v7 = vld [vmem:[%s4179_s0 + $0x18] sm:$0xff]  ;;  %vm718_vm15 = vcmask 1041408  }
   0x3   :  { %v235_v5 = vpack.c.bf16 %v212_v3, %v211_v2  ;;  %v213_v8 = vld [vmem:[%s4179_s0 + $0x90] sm:$0xff]  ;;  %v214_v9 = vld [vmem:[%s4179_s0 + $0x98] sm:$0xff]  ;;  %v228_v10 = vpack.c.bf16 %v198_v7, %v197_v6  ;;  %v199_v12 = vld [vmem:[%s4179_s0 + $0x20] sm:$0xff] }
   0x4   :  { %v236_v11 = vpack.c.bf16 %v214_v9, %v213_v8  ;;  %v200_v13 = vld [vmem:[%s4179_s0 + $0x28] sm:$0xff]  ;;  %v215_v14 = vld [vmem:[%s4179_s0 + $0xa0] sm:$0xff]  ;;  %v201_v18 = vld [vmem:[%s4179_s0 + $0x30] sm:$0xff] }
   0x5   :  { %2760 = vxpose.binary.xlu0.c.b16.start [1/16] (narrow) %v235_v5, %v227_v4, 16  ;;  %v216_v15 = vld [vmem:[%s4179_s0 + $0xa8] sm:$0xff]  ;;  %v229_v16 = vpack.c.bf16 %v200_v13, %v199_v12  ;;  %v202_v19 = vld [vmem:[%s4179_s0 + $0x38] sm:$0xff]  ;;  %v217_v20 = vld [vmem:[%s4179_s0 + $0xb0] sm:$0xff] }
   0x6   :  { %v237_v17 = vpack.c.bf16 %v216_v15, %v215_v14  ;;  %v218_v21 = vld [vmem:[%s4179_s0 + $0xb8] sm:$0xff]  ;;  %v230_v22 = vpack.c.bf16 %v202_v19, %v201_v18  ;;  %v203_v24 = vld [vmem:[%s4179_s0 + $0x40] sm:$0xff]  ;;  %v204_v25 = vld [vmem:[%s4179_s0 + $0x48] sm:$0xff] }
   0x7   :  { %v238_v23 = vpack.c.bf16 %v218_v21, %v217_v20  ;;  %v219_v26 = vld [vmem:[%s4179_s0 + $0xc0] sm:$0xff]  ;;  %v220_v27 = vld [vmem:[%s4179_s0 + $0xc8] sm:$0xff]  ;;  %v231_v28 = vpack.c.bf16 %v204_v25, %v203_v24  ;;  %v205_v30 = vld [vmem:[%s4179_s0 + $0x50] sm:$0xff] }
   0x8   :  { %v239_v29 = vpack.c.bf16 %v220_v27, %v219_v26  ;;  %v206_v31 = vld [vmem:[%s4179_s0 + $0x58] sm:$0xff]  ;;  %v221_v32 = vld [vmem:[%s4179_s0 + $0xd0] sm:$0xff]  ;;  %v207_v37 = vld [vmem:[%s4179_s0 + $0x60] sm:$0xff] }
   0x9   :  { %v222_v33 = vld [vmem:[%s4179_s0 + $0xd8] sm:$0xff]  ;;  %v232_v34 = vpack.c.bf16 %v206_v31, %v205_v30  ;;  %v208_v38 = vld [vmem:[%s4179_s0 + $0x68] sm:$0xff]  ;;  %v223_v39 = vld [vmem:[%s4179_s0 + $0xe0] sm:$0xff] }
   0xa   :  { %v240_v35 = vpack.c.bf16 %v222_v33, %v221_v32  ;;  %v2638_v36 = vld [vmem:[%s4180_s1 + $0xb8] sm:$0xff]  ;;  %v224_v40 = vld [vmem:[%s4179_s0 + $0xe8] sm:$0xff]  ;;  %v233_v41 = vpack.c.bf16 %v208_v38, %v207_v37  ;;  %v209_v43 = vld [vmem:[%s4179_s0 + $0x70] sm:$0xff] }
   0xb   :  { %408 = vmatpush.bf16.msra.mxu0 %v2638_v36  ;;  %v241_v42 = vpack.c.bf16 %v224_v40, %v223_v39  ;;  %v210_v44 = vld [vmem:[%s4179_s0 + $0x78] sm:$0xff]  ;;  %v225_v45 = vld [vmem:[%s4179_s0 + $0xf0] sm:$0xff]  ;;  %v2636_v50 = vld [vmem:[%s4180_s1 + $0xa8] sm:$0xff] }
   0xc   :  { %v226_v46 = vld [vmem:[%s4179_s0 + $0xf8] sm:$0xff]  ;;  %v234_v47 = vpack.c.bf16 %v210_v44, %v209_v43  ;;  %v2637_v49 = vld [vmem:[%s4180_s1 + $0xb0] sm:$0xff]  ;;  %v2635_v53 = vld [vmem:[%s4180_s1 + $0xa0] sm:$0xff] }
   0xd   :  { %v242_v48 = vpack.c.bf16 %v226_v46, %v225_v45  ;;  %v2622_v51 = vld [vmem:[%s4180_s1 + $0x38] sm:$0xff]  ;;  %v2621_v54 = vld [vmem:[%s4180_s1 + $0x30] sm:$0xff]  ;;  %v2620_v57 = vld [vmem:[%s4180_s1 + $0x28] sm:$0xff] }
   0xe   :  { %v2630_v52 = vld [vmem:[%s4180_s1 + $0x78] sm:$0xff]  ;;  %549 = vmatpush.bf16.msra.mxu1 %v2622_v51  ;;  %v2629_v55 = vld [vmem:[%s4180_s1 + $0x70] sm:$0xff]  ;;  %v2628_v58 = vld [vmem:[%s4180_s1 + $0x68] sm:$0xff] }
   0xf   :  { %409 = vmatpush.bf16.msra.mxu0 %v2637_v49  ;;  %563 = vmatpush.bf16.msra.mxu2 %v2630_v52  ;;  %v2634_v56 = vld [vmem:[%s4180_s1 + $0x98] sm:$0xff]  ;;  %v2633_v59 = vld [vmem:[%s4180_s1 + $0x90] sm:$0xff]  ;;  %v2619_v60 = vld [vmem:[%s4180_s1 + $0x20] sm:$0xff] }
  0x10   :  { %v2627_v61 = vld [vmem:[%s4180_s1 + $0x60] sm:$0xff]  ;;  %v2632_v62 = vld [vmem:[%s4180_s1 + $0x88] sm:$0xff]  ;;  %v2618_v63 = vld [vmem:[%s4180_s1 + $0x18] sm:$0xff] }
  0x11   :  { %v2626_v0 = vld [vmem:[%s4180_s1 + $0x58] sm:$0xff]  ;;  %v2631_v1 = vld [vmem:[%s4180_s1 + $0x80] sm:$0xff]  ;;  %v2617_v2 = vld [vmem:[%s4180_s1 + $0x10] sm:$0xff] }
  0x12   :  { %550 = vmatpush.bf16.msra.mxu1 %v2621_v54  ;;  %v2625_v3 = vld [vmem:[%s4180_s1 + $0x50] sm:$0xff]  ;;  %v2616_v6 = vld [vmem:[%s4180_s1 + $0x8] sm:$0xff]  ;;  %v2770_v51 = vld [vmem:[%s4181_s2] ss:$0 sm:$0xff] }
  0x13   :  { %410 = vmatpush.bf16.msra.mxu0 %v2636_v50  ;;  %564 = vmatpush.bf16.msra.mxu2 %v2629_v55  ;;  %v2624_v7 = vld [vmem:[%s4180_s1 + $0x48] sm:$0xff]  ;;  %vm3293_vm13 = vmand %vm285_vm0, %vm698_vm12 }
  0x15   :  { %2761 = vxpose.binary.xlu0.c.b16.cont [2/16] (narrow) %v236_v11, %v228_v10, 16  ;;  %v2615_v10 = vld [vmem:[%s4180_s1] sm:$0xff] }
  0x16   :  { %551 = vmatpush.bf16.msra.mxu1 %v2620_v57  ;;  %v2623_v11 = vld [vmem:[%s4180_s1 + $0x40] sm:$0xff] }
  0x17   :  { %411 = vmatpush.bf16.msra.mxu0 %v2635_v53  ;;  %565 = vmatpush.bf16.msra.mxu2 %v2628_v58 }
  0x1a   :  { %552 = vmatpush.bf16.msra.mxu1 %v2619_v60 }
  0x1b   :  { %412 = vmatpush.bf16.msra.mxu0 %v2634_v56  ;;  %566 = vmatpush.bf16.msra.mxu2 %v2627_v61 }
  0x1e   :  { %553 = vmatpush.bf16.msra.mxu1 %v2618_v63 }
  0x1f   :  { %413 = vmatpush.bf16.msra.mxu0 %v2633_v59  ;;  %567 = vmatpush.bf16.msra.mxu2 %v2626_v0  ;;  %v2183_v0 = vld [vmem:[%s4182_s3 + $0x170] sm:$0xf] }
  0x22   :  { %554 = vmatpush.bf16.msra.mxu1 %v2617_v2 }
  0x23   :  { %414 = vmatpush.bf16.msra.mxu0 %v2632_v62  ;;  %568 = vmatpush.bf16.msra.mxu2 %v2625_v3 }
  0x25   :  { %2762 = vxpose.binary.xlu0.c.b16.cont [3/16] (narrow) %v237_v17, %v229_v16, 16 }
  0x26   :  { %555 = vmatpush.bf16.msra.mxu1 %v2616_v6 }
  0x27   :  { %415 = vmatpush.bf16.msra.mxu0 %v2631_v1  ;;  %569 = vmatpush.bf16.msra.mxu2 %v2624_v7  ;;  %v2686_v1 = vld [vmem:[%s4182_s3 + $0x174] sm:$0xf0]  ;;  %v2175_v7 = vld [vmem:[%s4182_s3 + $0x160] sm:$0xf] }
  0x28   :  { %v2184_v3 = vor.u32 %v2686_v1, %v2183_v0 }
  0x2a   :  { %556 = vmatpush.bf16.msra.mxu1 %v2615_v10  ;;  %852 = vmatpush.bf16.msra.mxu3 %v2184_v3 }
  0x2b   :  { %570 = vmatpush.bf16.msra.mxu2 %v2623_v11  ;;  %v2177_v11 = vld [vmem:[%s4182_s3 + $0x168] sm:$0xf0] }
  0x35   :  { %2763 = vxpose.binary.xlu0.c.b16.cont [4/16] (narrow) %v238_v23, %v230_v22, 16 }
  0x45   :  { %2764 = vxpose.binary.xlu0.c.b16.cont [5/16] (narrow) %v239_v29, %v231_v28, 16 }
  0x55   :  { %2765 = vxpose.binary.xlu0.c.b16.cont [6/16] (narrow) %v240_v35, %v232_v34, 16 }
  0x65   :  { %2766 = vxpose.binary.xlu0.c.b16.cont [7/16] (narrow) %v241_v42, %v233_v41, 16 }
  0x75   :  { %2767 = vxpose.binary.xlu0.c.b16.end [8/16] (narrow) %v242_v48, %v234_v47, 16 }
  0xb1   :  { %v2768_v4 = vpop.trf.xlu0 }
  0xb2   :  { %v277_v5 = vunpack.i.h.s16 %v2768_v4 }
  0xb4   :  { %v2012_v8 = vpack.c.b16 %v277_v5, %v2768_v4  ;;  %v2685_v4 = vld [vmem:[%s4182_s3 + $0x174] sm:$0xf]  ;;  %v2185_v5 = vld [vmem:[%s4182_s3 + $0x178] sm:$0xf0] }
  0xb5   :  { %v2188_v6 = vor.u32 %v2685_v4, %v2185_v5  ;;  %v2652_v4 = vld [vmem:[%s4182_s3 + $0x64] sm:$0xf0]  ;;  %v2303_v5 = vld [vmem:[%s4182_s3 + $0xe0] sm:$0xf] }
  0xb6   :  { %v283_v9 = vrot.slane %v2012_v8, 3 }
  0xb7   :  { %865 = vmatpush.bf16.msrb.mxu0 %v2188_v6  ;;  %v2233_v6 = vld [vmem:[%s4182_s3 + $0x58] sm:$0xf0] }
  0xb8   :  { %v288_v12 = vsel %vm285_vm0, %v2012_v8, %v283_v9  ;;  %v291_v13 = vsel %vm290_vm1, %v2012_v8, %v283_v9  ;;  %v295_v14 = vsel %vm294_vm2, %v2012_v8, %v283_v9  ;;  %v299_v15 = vsel %vm298_vm3, %v2012_v8, %v283_v9  ;;  %v2684_v8 = vld [vmem:[%s4182_s3 + $0x164] sm:$0xf0]  ;;  %v2683_v9 = vld [vmem:[%s4182_s3 + $0x164] sm:$0xf] }
  0xb9   :  { %v293_v16 = vrot.slane %v291_v13, 1  ;;  %v297_v17 = vrot.slane %v295_v14, 2  ;;  %v316_v18 = vunpack.i.h.s16 %v288_v12  ;;  %v2769_v19 = vpop.trf.xlu0  ;;  %v301_v21 = vrot.slane %v299_v15, 3  ;;  %v2167_v14 = vld [vmem:[%s4182_s3 + $0x150] sm:$0xf] }
  0xba   :  { %v281_v20 = vunpack.i.h.s16 %v2769_v19  ;;  %v2176_v10 = vor.u32 %v2684_v8, %v2175_v7  ;;  %v2682_v15 = vld [vmem:[%s4182_s3 + $0x154] sm:$0xf0]  ;;  %v2137_v7 = vld [vmem:[%s4182_s3 + $0x118] sm:$0xf0] }
  0xbb   :  { %v318_v22 = vunpack.i.h.s16 %v293_v16  ;;  %v320_v23 = vunpack.i.h.s16 %v297_v17  ;;  %v2014_v24 = vpack.i.b16 %v293_v16, %v316_v18  ;;  %v329_v33 = vunpack.i.h.s16 %v301_v21 }
  0xbc   :  { %v2013_v25 = vpack.c.b16 %v281_v20, %v2769_v19  ;;  %853 = vmatpush.bf16.msra.mxu3 %v2176_v10  ;;  %v2168_v20 = vor.u32 %v2682_v15, %v2167_v14  ;;  %v3158_v14 = vld [vmem:[%s4182_s3 + $0x104] sm:$0xf0]  ;;  %v2231_v15 = vld [vmem:[%s4182_s3 + $0x50] sm:$0xf] }
  0xbd   :  { %v2015_v26 = vpack.i.b16 %v297_v17, %v318_v22  ;;  %v2016_v27 = vpack.i.b16 %v301_v21, %v320_v23  ;;  %339 = vst [vmem:[#allocation1] ss:$9 sm:$0xff] %v2014_v24 }
  0xbe   :  { %v284_v28 = vrot.slane %v2013_v25, 3 }
  0xbf   :  { %342 = vst [vmem:[#allocation1 + $0x1] ss:$9 sm:$0xff] %v2015_v26 }
  0xc0   :  { %345 = vst [vmem:[#allocation1 + $0x2] ss:$9 sm:$0xff] %v2016_v27  ;;  %v304_v29 = vsel %vm285_vm0, %v2013_v25, %v284_v28  ;;  %v306_v30 = vsel %vm290_vm1, %v2013_v25, %v284_v28  ;;  %v309_v31 = vsel %vm294_vm2, %v2013_v25, %v284_v28  ;;  %v312_v32 = vsel %vm298_vm3, %v2013_v25, %v284_v28  ;;  %v2159_v27 = vld [vmem:[%s4182_s3 + $0x140] sm:$0xf]  ;;  %v2680_v28 = vld [vmem:[%s4182_s3 + $0x144] sm:$0xf0] }
  0xc1   :  { %v308_v34 = vrot.slane %v306_v30, 1  ;;  %v311_v35 = vrot.slane %v309_v31, 2  ;;  %v323_v36 = vunpack.i.h.s16 %v304_v29  ;;  %v314_v37 = vrot.slane %v312_v32, 3  ;;  %854 = vmatpush.bf16.msra.mxu3 %v2168_v20  ;;  %v2666_v20 = vld [vmem:[%s4182_s3 + $0xd4] sm:$0xf0] }
  0xc2   :  { %v2049_v42 = vpack.i.b16 %v304_v29, %v301_v21  ;;  %v2169_v21 = vld [vmem:[%s4182_s3 + $0x158] sm:$0xf0]  ;;  %v2160_v32 = vor.u32 %v2680_v28, %v2159_v27  ;;  %v2653_v29 = vld [vmem:[%s4182_s3 + $0x74] sm:$0xf] }
  0xc3   :  { %v334_v38 = vpack.i.b16 %v323_v36, %v329_v33  ;;  %351 = vst [vmem:[#allocation1 + $0x4] ss:$9 sm:$0xff] %v308_v34  ;;  %v325_v39 = vunpack.i.h.s16 %v308_v34  ;;  %v327_v41 = vunpack.i.h.s16 %v311_v35  ;;  %v2050_v43 = vpack.i.b16 %v308_v34, %v323_v36  ;;  %v2679_v33 = vld [vmem:[%s4182_s3 + $0x144] sm:$0xf]  ;;  %v2161_v34 = vld [vmem:[%s4182_s3 + $0x148] sm:$0xf0] }
  0xc4   :  { %354 = vst [vmem:[#allocation1 + $0x5] ss:$9 sm:$0xff] %v311_v35  ;;  %v2164_v36 = vor.u32 %v2679_v33, %v2161_v34 }
  0xc5   :  { %348 = vst [vmem:[#allocation1 + $0x3] ss:$9 sm:$0xff] %v334_v38  ;;  %v2051_v44 = vpack.i.b16 %v311_v35, %v325_v39  ;;  %v2052_v45 = vpack.i.b16 %v314_v37, %v327_v41  ;;  %v2678_v38 = vld [vmem:[%s4182_s3 + $0x134] sm:$0xf0]  ;;  %v2677_v39 = vld [vmem:[%s4182_s3 + $0x134] sm:$0xf]  ;;  %855 = vmatpush.bf16.msra.mxu3 %v2160_v32 }
  0xc6   :  { %357 = vst [vmem:[#allocation1 + $0x6] ss:$9 sm:$0xff] %v314_v37  ;;  %v2151_v37 = vld [vmem:[%s4182_s3 + $0x130] sm:$0xf]  ;;  %v2153_v41 = vld [vmem:[%s4182_s3 + $0x138] sm:$0xf0] }
  0xcd   :  { %v358_v40 = vld [vmem:[#allocation1] sm:$0xff] }
  0xce   :  { %430 = vst [vmem:[#allocation1] ss:$9 sm:$0xff] %v288_v12  ;;  %416 = vmatmul.bf16.vlgmr.msra.gmra.mxu0 %v358_v40  ;;  %v2180_v12 = vor.u32 %v2683_v9, %v2177_v11  ;;  %v2152_v40 = vor.u32 %v2678_v38, %v2151_v37  ;;  %v2668_v9 = vld [vmem:[%s4182_s3 + $0xe4] sm:$0xf0]  ;;  %v2223_v37 = vld [vmem:[%s4182_s3 + $0x40] sm:$0xf] }
  0xcf   :  { %433 = vst [vmem:[#allocation1 + $0x1] ss:$9 sm:$0xff] %v293_v16  ;;  %v2681_v16 = vld [vmem:[%s4182_s3 + $0x154] sm:$0xf]  ;;  %v2648_v38 = vld [vmem:[%s4182_s3 + $0x44] sm:$0xf0] }
  0xd0   :  { %436 = vst [vmem:[#allocation1 + $0x2] ss:$9 sm:$0xff] %v297_v17  ;;  %866 = vmatpush.bf16.msrb.mxu0 %v2180_v12  ;;  %v2172_v23 = vor.u32 %v2681_v16, %v2169_v21  ;;  %856 = vmatpush.bf16.msra.mxu3 %v2152_v40  ;;  %v2304_v12 = vor.u32 %v2668_v9, %v2303_v5  ;;  %v2649_v5 = vld [vmem:[%s4182_s3 + $0x54] sm:$0xf]  ;;  %v2297_v9 = vld [vmem:[%s4182_s3 + $0xd8] sm:$0xf0] }
  0xd1   :  { %439 = vst [vmem:[#allocation1 + $0x3] ss:$9 sm:$0xff] %v2049_v42  ;;  %v2143_v42 = vld [vmem:[%s4182_s3 + $0x120] sm:$0xf] }
  0xd2   :  { %442 = vst [vmem:[#allocation1 + $0x4] ss:$9 sm:$0xff] %v2050_v43  ;;  %v2676_v43 = vld [vmem:[%s4182_s3 + $0x124] sm:$0xf0] }
  0xd3   :  { %445 = vst [vmem:[#allocation1 + $0x5] ss:$9 sm:$0xff] %v2051_v44 }
  0xd4   :  { %448 = vst [vmem:[#allocation1 + $0x6] ss:$9 sm:$0xff] %v2052_v45  ;;  %867 = vmatpush.bf16.msrb.mxu0 %v2172_v23  ;;  %v2156_v45 = vor.u32 %v2677_v39, %v2153_v41 }
  0xd8   :  { %868 = vmatpush.bf16.msrb.mxu0 %v2164_v36  ;;  %v2313_v36 = vld [vmem:[%s4182_s3 + $0xf8] sm:$0xf0] }
  0xdb   :  { %v449_v46 = vld [vmem:[#allocation1] sm:$0xff]  ;;  %v450_v47 = vld [vmem:[#allocation1 + $0x9] sm:$0xff] }
  0xdc   :  { %557 = vmatmul.bf16.vlgmr.msra.gmra.mxu1 %v449_v46  ;;  %571 = vmatmul.bf16.vlgmr.msra.gmra.mxu2 %v450_v47  ;;  %v2675_v46 = vld [vmem:[%s4182_s3 + $0x124] sm:$0xf]  ;;  %v2145_v47 = vld [vmem:[%s4182_s3 + $0x128] sm:$0xf0] }
  0xdd   :  { %869 = vmatpush.bf16.msrb.mxu0 %v2156_v45  ;;  %v2148_v3 = vor.u32 %v2675_v46, %v2145_v47  ;;  %v2664_v45 = vld [vmem:[%s4182_s3 + $0xc4] sm:$0xf0] }
  0xe1   :  { %870 = vmatpush.bf16.msrb.mxu0 %v2148_v3 }
 0x14b   :  { %v417_v49 = vpop.f32.mrf.mxu0 }
 0x153   :  { %v419_v57 = vpop.f32.mrf.mxu0 }
 0x159   :  { %v558_v48 = vpop.f32.mrf.mxu1 }
 0x15a   :  { %v559_v50 = vadd.f32 %v558_v48, %v417_v49  ;;  %v2247_v48 = vld [vmem:[%s4182_s3 + $0x70] sm:$0xf] }
 0x15f   :  { %v572_v52 = vpop.f32.mrf.mxu2 }
 0x160   :  { %v573_v53 = vadd.f32 %v572_v52, %v559_v50  ;;  %v2654_v50 = vld [vmem:[%s4182_s3 + $0x74] sm:$0xf0] }
 0x161   :  { %v560_v55 = vpop.f32.mrf.mxu1  ;;  %v2670_v52 = vld [vmem:[%s4182_s3 + $0xf4] sm:$0xf0] }
 0x162   :  { %v3006_v54 = vadd.f32 %v2770_v51, %v573_v53  ;;  %v561_v58 = vadd.f32 %v560_v55, %v419_v57 }
 0x164   :  { %v2117_v56 = vmul.f32 -1.442695, %v3006_v54 }
 0x166   :  { %2771 = vpow2.f32 %v2117_v56  ;;  %v2248_v56 = vor.u32 %v2654_v50, %v2247_v48  ;;  %v2651_v50 = vld [vmem:[%s4182_s3 + $0x64] sm:$0xf] }
 0x167   :  { %v574_v59 = vpop.f32.mrf.mxu2 }
 0x168   :  { %v575_v60 = vadd.f32 %v574_v59, %v561_v58  ;;  %v2144_v58 = vor.u32 %v2676_v43, %v2143_v42  ;;  %1045 = vmatpush.bf16.msrb.mxu1 %v2248_v56  ;;  %v2241_v56 = vld [vmem:[%s4182_s3 + $0x68] sm:$0xf0]  ;;  %v2642_v42 = vld [vmem:[%s4182_s3 + $0x14] sm:$0xf0] }
 0x16a   :  { %v3009_v61 = vadd.f32 %v2770_v51, %v575_v60  ;;  %v2311_v51 = vld [vmem:[%s4182_s3 + $0xf0] sm:$0xf]  ;;  %857 = vmatpush.bf16.msra.mxu3 %v2144_v58 }
 0x16b   :  { %v2312_v59 = vor.u32 %v2670_v52, %v2311_v51  ;;  %v2135_v60 = vld [vmem:[%s4182_s3 + $0x110] sm:$0xf] }
 0x16c   :  { %v2772_v62 = vpop.eup %2771  ;;  %v2118_v63 = vmul.f32 -1.442695, %v3009_v61 }
 0x16d   :  { %v3018_v2 = vadd.f32 1.0, %v2772_v62  ;;  %v2674_v62 = vld [vmem:[%s4182_s3 + $0x114] sm:$0xf0]  ;;  %1058 = vmatpush.bf16.msrb.mxu2 %v2312_v59  ;;  %v2224_v59 = vor.u32 %v2648_v38, %v2223_v37 }
 0x16e   :  { %2773 = vpow2.f32 %v2118_v63  ;;  %v2239_v63 = vld [vmem:[%s4182_s3 + $0x60] sm:$0xf]  ;;  %v2136_v16 = vor.u32 %v2674_v62, %v2135_v60  ;;  %v2215_v62 = vld [vmem:[%s4182_s3 + $0x30] sm:$0xf] }
 0x16f   :  { %2775 = vrcp.f32 %v3018_v2  ;;  %v602_v18 = vand.u32 2147483648, %v3018_v2  ;;  %v600_v24 = vand.u32 2147483647, %v3018_v2  ;;  %vm596_vm5 = vweird.f32 %v3018_v2 }
 0x170   :  { %v2240_v8 = vor.u32 %v2652_v4, %v2239_v63  ;;  %858 = vmatpush.bf16.msra.mxu3 %v2136_v16  ;;  %v2646_v63 = vld [vmem:[%s4182_s3 + $0x34] sm:$0xf0]  ;;  %v2660_v16 = vld [vmem:[%s4182_s3 + $0xa4] sm:$0xf0] }
 0x171   :  { %v603_v30 = vor.u32 1.1754944e-38, %v602_v18  ;;  %vm601_vm7 = vcmp.eq.f32.partialorder %v600_v24, 8.507059e+37  ;;  %v2295_v18 = vld [vmem:[%s4182_s3 + $0xd0] sm:$0xf]  ;;  %v2671_v24 = vld [vmem:[%s4182_s3 + $0x104] sm:$0xf]  ;;  %1059 = vmatpush.bf16.msrb.mxu2 %v2304_v12 }
 0x172   :  { %1046 = vmatpush.bf16.msrb.mxu1 %v2240_v8  ;;  %v2296_v28 = vor.u32 %v2666_v20, %v2295_v18  ;;  %v2662_v4 = vld [vmem:[%s4182_s3 + $0xb4] sm:$0xf0]  ;;  %v2665_v8 = vld [vmem:[%s4182_s3 + $0xd4] sm:$0xf]  ;;  %v2207_v12 = vld [vmem:[%s4182_s3 + $0x20] sm:$0xf] }
 0x173   :  { %v2300_v18 = vor.u32 %v2665_v8, %v2297_v9  ;;  %v2647_v20 = vld [vmem:[%s4182_s3 + $0x44] sm:$0xf]  ;;  %v2377_v8 = vld [vmem:[%s4184_s5 + $0x130] sm:$0xf] }
 0x174   :  { %v2774_v13 = vpop.eup %2773 }
 0x175   :  { %v2776_v17 = vpop.eup %2775  ;;  %v3049_v19 = vadd.f32 1.0, %v2774_v13  ;;  %v3153_v13 = vld [vmem:[%s4182_s3 + $0x100] sm:$0xf]  ;;  %1060 = vmatpush.bf16.msrb.mxu2 %v2296_v28 }
 0x176   :  { %v592_v22 = vmul.f32 %v2776_v17, %v3018_v2  ;;  %vm597_vm4 = vweird.f32 %v2776_v17  ;;  %v2128_v27 = vor.u32 %v3158_v14, %v3153_v13  ;;  %v2644_v13 = vld [vmem:[%s4182_s3 + $0x24] sm:$0xf0] }
 0x177   :  { %2777 = vrcp.f32 %v3049_v19  ;;  %v615_v25 = vand.u32 2147483647, %v3049_v19  ;;  %vm3065_vm6 = vmor %vm596_vm5, %vm597_vm4  ;;  %v617_v31 = vand.u32 2147483648, %v3049_v19  ;;  %vm611_vm10 = vweird.f32 %v3049_v19 }
 0x178   :  { %v593_v26 = vsub.f32 1.0, %v592_v22  ;;  %859 = vmatpush.bf16.msra.mxu3 %v2128_v27  ;;  %vm733_vm4 = vsmask.f32 3336  ;;  %vm735_vm5 = vsmask.f32 5392 }
 0x179   :  { %v3128_v2 = vor.u32 1.1754944e-38, %v617_v31  ;;  %vm3136_vm8 = vcmp.eq.f32.partialorder %v615_v25, 8.507059e+37  ;;  %v2129_v25 = vld [vmem:[%s4182_s3 + $0x108] sm:$0xf0]  ;;  %v2669_v31 = vld [vmem:[%s4182_s3 + $0xf4] sm:$0xf] }
 0x17a   :  { %v594_v35 = vmul.f32 %v2776_v17, %v593_v26  ;;  %v2132_v43 = vor.u32 %v2671_v24, %v2129_v25  ;;  %v2225_v24 = vld [vmem:[%s4182_s3 + $0x48] sm:$0xf0]  ;;  %v2663_v25 = vld [vmem:[%s4182_s3 + $0xc4] sm:$0xf]  ;;  %v2705_v27 = vld [vmem:[%s4184_s5 + $0x94] sm:$0xf] }
 0x17c   :  { %v595_v44 = vadd.f32 %v2776_v17, %v594_v35 }
 0x17d   :  { %v3103_v49 = vpop.eup %2777 }
 0x17e   :  { %v599_v53 = vsel %vm3065_vm6, %v2776_v17, %v595_v44  ;;  %v607_v55 = vmul.f32 %v3103_v49, %v3049_v19  ;;  %vm612_vm9 = vweird.f32 %v3103_v49  ;;  %v2650_v17 = vld [vmem:[%s4182_s3 + $0x54] sm:$0xf0]  ;;  %v2287_v44 = vld [vmem:[%s4182_s3 + $0xc0] sm:$0xf] }
 0x17f   :  { %v604_v57 = vsel %vm601_vm7, %v603_v30, %v599_v53  ;;  %v2232_v26 = vor.u32 %v2650_v17, %v2231_v15  ;;  %v2249_v30 = vld [vmem:[%s4182_s3 + $0x78] sm:$0xf0]  ;;  %vm3211_vm11 = vmor %vm611_vm10, %vm612_vm9  ;;  %v2288_v60 = vor.u32 %v2664_v45, %v2287_v44  ;;  %v2271_v15 = vld [vmem:[%s4182_s3 + $0xa0] sm:$0xf]  ;;  %v2236_v17 = vor.u32 %v2649_v5, %v2233_v6 }
 0x180   :  { %v621_v0 = vmul.f32 %v604_v57, %v3006_v54  ;;  %v608_v1 = vsub.f32 1.0, %v607_v55  ;;  %v2673_v54 = vld [vmem:[%s4182_s3 + $0x114] sm:$0xf]  ;;  %v2252_v48 = vor.u32 %v2653_v29, %v2249_v30  ;;  %v2316_v55 = vor.u32 %v2669_v31, %v2313_v36  ;;  %v2305_v57 = vld [vmem:[%s4182_s3 + $0xe8] sm:$0xf0] }
 0x181   :  { %v2140_v23 = vor.u32 %v2673_v54, %v2137_v7  ;;  %1047 = vmatpush.bf16.msrb.mxu1 %v2232_v26  ;;  %v2244_v54 = vor.u32 %v2651_v50, %v2241_v56  ;;  %1061 = vmatpush.bf16.msrb.mxu2 %v2288_v60  ;;  %v2289_v26 = vld [vmem:[%s4182_s3 + $0xc8] sm:$0xf0]  ;;  %v2658_v45 = vld [vmem:[%s4182_s3 + $0x94] sm:$0xf0]  ;;  %v2191_v56 = vld [vmem:[%s4182_s3] sm:$0xf] }
 0x182   :  { %v623_v10 = vpack.c.bf16 %v621_v0, %v621_v0  ;;  %v609_v11 = vmul.f32 %v3103_v49, %v608_v1  ;;  %1071 = vmatpush.bf16.msrb.mxu3 %v2252_v48  ;;  %v2659_v5 = vld [vmem:[%s4182_s3 + $0xa4] sm:$0xf]  ;;  %vm737_vm7 = vsmask.f32 7448 }
 0x183   :  { %871 = vmatpush.bf16.msrb.mxu0 %v2140_v23  ;;  %v2272_v23 = vor.u32 %v2660_v16, %v2271_v15  ;;  %v2201_v15 = vld [vmem:[%s4182_s3 + $0x18] sm:$0xf0] }
 0x184   :  { %v627_v21 = vrot.slane %v623_v10, 3  ;;  %v610_v22 = vadd.f32 %v3103_v49, %v609_v11 }
 0x185   :  { %1048 = vmatpush.bf16.msrb.mxu1 %v2224_v59 }
 0x186   :  { %v631_v32 = vsel %vm285_vm0, %v623_v10, %v627_v21  ;;  %v633_v33 = vsel %vm290_vm1, %v623_v10, %v627_v21  ;;  %v636_v34 = vsel %vm294_vm2, %v623_v10, %v627_v21  ;;  %v3196_v35 = vsel %vm298_vm3, %v623_v10, %v627_v21  ;;  %1072 = vmatpush.bf16.msrb.mxu3 %v2244_v54  ;;  %v2273_v54 = vld [vmem:[%s4182_s3 + $0xa8] sm:$0xf0] }
 0x187   :  { %v635_v39 = vrot.slane %v633_v33, 1  ;;  %v638_v40 = vrot.slane %v636_v34, 2  ;;  %v653_v41 = vunpack.i.h.s16 %v631_v32  ;;  %v641_v46 = vrot.slane %v3196_v35, 3  ;;  %872 = vmatpush.bf16.msrb.mxu0 %v2132_v43  ;;  %v2263_v43 = vld [vmem:[%s4182_s3 + $0x90] sm:$0xf] }
 0x188   :  { %v2119_v47 = vpack.i.b16 %v631_v32, %v631_v32  ;;  %v614_v19 = vsel %vm3211_vm11, %v3103_v49, %v610_v22  ;;  %v2667_v49 = vld [vmem:[%s4182_s3 + $0xe4] sm:$0xf]  ;;  %v2216_v10 = vor.u32 %v2646_v63, %v2215_v62  ;;  %v2208_v22 = vor.u32 %v2644_v13, %v2207_v12  ;;  %v2656_v62 = vld [vmem:[%s4182_s3 + $0x84] sm:$0xf0] }
 0x189   :  { %v655_v51 = vunpack.i.h.s16 %v635_v39  ;;  %v657_v52 = vunpack.i.h.s16 %v638_v40  ;;  %v2120_v53 = vpack.i.b16 %v635_v39, %v653_v41  ;;  %v619_v58 = vsel %vm3136_vm8, %v3128_v2, %v614_v19  ;;  %v2279_v2 = vld [vmem:[%s4182_s3 + $0xb0] sm:$0xf]  ;;  %v2643_v63 = vld [vmem:[%s4182_s3 + $0x24] sm:$0xf] }
 0x18a   :  { %675 = vst [vmem:[#allocation1] ss:$9 sm:$0xff] %v2119_v47  ;;  %v622_v3 = vmul.f32 %v619_v58, %v3009_v61  ;;  %v2308_v7 = vor.u32 %v2667_v49, %v2305_v57  ;;  %v2280_v11 = vor.u32 %v2662_v4, %v2279_v2  ;;  %1049 = vmatpush.bf16.msrb.mxu1 %v2216_v10  ;;  %v659_v28 = vunpack.i.h.s16 %v641_v46  ;;  %v2199_v41 = vld [vmem:[%s4182_s3 + $0x10] sm:$0xf]  ;;  %v2217_v47 = vld [vmem:[%s4182_s3 + $0x38] sm:$0xf0] }
 0x18b   :  { %v2121_v0 = vpack.i.b16 %v638_v40, %v655_v51  ;;  %v2122_v1 = vpack.i.b16 %v641_v46, %v657_v52  ;;  %678 = vst [vmem:[#allocation1 + $0x1] ss:$9 sm:$0xff] %v2120_v53  ;;  %1084 = vmatpush.bf16.msra.mxu0 %v2316_v55  ;;  %1073 = vmatpush.bf16.msrb.mxu3 %v2236_v17  ;;  %vm732_vm3 = vsmask.f32 1280  ;;  %v2645_v46 = vld [vmem:[%s4182_s3 + $0x34] sm:$0xf] }
 0x18c   :  { %v624_v61 = vpack.c.bf16 %v622_v3, %v622_v3  ;;  %1062 = vmatpush.bf16.msrb.mxu2 %v2280_v11  ;;  %v2228_v33 = vor.u32 %v2647_v20, %v2225_v24  ;;  %v2292_v34 = vor.u32 %v2663_v25, %v2289_v26  ;;  %v670_v35 = vpack.i.b16 %v659_v28, %v659_v28  ;;  %vm3323_vm6 = vmor %vm732_vm3, %vm733_vm4  ;;  %v2661_v52 = vld [vmem:[%s4182_s3 + $0xb4] sm:$0xf]  ;;  %v2281_v53 = vld [vmem:[%s4182_s3 + $0xb8] sm:$0xf0] }
 0x18d   :  { %681 = vst [vmem:[#allocation1 + $0x2] ss:$9 sm:$0xff] %v2121_v0  ;;  %v2200_v44 = vor.u32 %v2642_v42, %v2199_v41  ;;  %v2264_v50 = vor.u32 %v2658_v45, %v2263_v43  ;;  %v2220_v51 = vor.u32 %v2645_v46, %v2217_v47  ;;  %v2284_v55 = vor.u32 %v2661_v52, %v2281_v53  ;;  %v2640_v49 = vld [vmem:[%s4182_s3 + $0x4] sm:$0xf0]  ;;  %v2255_v57 = vld [vmem:[%s4182_s3 + $0x80] sm:$0xf]  ;;  %vm3368_vm8 = vmor %vm3323_vm6, %vm735_vm5 }
 0x18e   :  { %684 = vst [vmem:[#allocation1 + $0x3] ss:$9 sm:$0xff] %v2122_v1  ;;  %v628_v14 = vrot.slane %v624_v61, 3  ;;  %1050 = vmatpush.bf16.msrb.mxu1 %v2208_v22  ;;  %v2192_v60 = vor.u32 %v2640_v49, %v2191_v56  ;;  %v2209_v0 = vld [vmem:[%s4182_s3 + $0x28] sm:$0xf0]  ;;  %v2256_v4 = vor.u32 %v2656_v62, %v2255_v57  ;;  %v2276_v13 = vor.u32 %v2659_v5, %v2273_v54  ;;  %vm3388_vm9 = vmor %vm3368_vm8, %vm737_vm7 }
 0x18f   :  { %1085 = vmatpush.bf16.msra.mxu0 %v2308_v7  ;;  %1074 = vmatpush.bf16.msrb.mxu3 %v2228_v33  ;;  %v2657_v20 = vld [vmem:[%s4182_s3 + $0x94] sm:$0xf]  ;;  %v2639_v24 = vld [vmem:[%s4182_s3 + $0x4] sm:$0xf]  ;;  %v2193_v25 = vld [vmem:[%s4182_s3 + $0x8] sm:$0xf0] }
 0x190   :  { %v646_v21 = vsel %vm290_vm1, %v624_v61, %v628_v14  ;;  %v649_v29 = vsel %vm294_vm2, %v624_v61, %v628_v14  ;;  %v644_v30 = vsel %vm285_vm0, %v624_v61, %v628_v14  ;;  %1063 = vmatpush.bf16.msrb.mxu2 %v2272_v23  ;;  %vm725_vm1 = vcmask 1043458   ;;  %v2641_v14 = vld [vmem:[%s4182_s3 + $0x14] sm:$0xf]  ;;  %v1097_v56 = vld [vmem:[%s4183_s4] sm:$0x3] }
 0x191   :  { %v648_v31 = vrot.slane %v646_v21, 1  ;;  %v651_v36 = vrot.slane %v649_v29, 2  ;;  %v2212_v61 = vor.u32 %v2643_v63, %v2209_v0  ;;  %v2265_v21 = vld [vmem:[%s4182_s3 + $0x98] sm:$0xf0]  ;;  %v1100_v5 = vperm.slane %v1097_v56, 1 }
 0x192   :  { %1051 = vmatpush.bf16.msrb.mxu1 %v2200_v44  ;;  %v2268_v23 = vor.u32 %v2657_v20, %v2265_v21  ;;  %v2361_v21 = vld [vmem:[%s4184_s5 + $0x110] sm:$0xf]  ;;  %vm1195_vm8 = vsmask.f32 2304 }
 0x193   :  { %1086 = vmatpush.bf16.msra.mxu0 %v2300_v18  ;;  %1075 = vmatpush.bf16.msrb.mxu3 %v2220_v51  ;;  %v2204_v18 = vor.u32 %v2641_v14, %v2201_v15  ;;  %v2369_v14 = vld [vmem:[%s4184_s5 + $0x120] sm:$0xf]  ;;  %v2724_v15 = vld [vmem:[%s4184_s5 + $0x124] sm:$0xf0]  ;;  %v2575_v22 = vld [vmem:[%s4184_s5 + $0x1f0] sm:$0xf] }
 0x194   :  { %1064 = vmatpush.bf16.msrb.mxu2 %v2264_v50 }
 0x195   :  { %v685_v32 = vld [vmem:[#allocation1] sm:$0xff] }
 0x196   :  { %689 = vst [vmem:[#allocation1 + $0x1] ss:$9 sm:$0xff] %v644_v30  ;;  %v700_v37 = vsel %vm3293_vm13, 0, %v685_v32  ;;  %1052 = vmatpush.bf16.msrb.mxu1 %v2192_v60  ;;  %v2655_v30 = vld [vmem:[%s4182_s3 + $0x84] sm:$0xf]  ;;  %v2196_v32 = vor.u32 %v2639_v24, %v2193_v25 }
 0x197   :  { %691 = vst [vmem:[#allocation1 + $0x2] ss:$9 sm:$0xff] %v648_v31  ;;  %v705_v38 = vsel %vm702_vm14, %v700_v37, 0  ;;  %1087 = vmatpush.bf16.msra.mxu0 %v2292_v34  ;;  %1076 = vmatpush.bf16.msrb.mxu3 %v2212_v61  ;;  %v2257_v31 = vld [vmem:[%s4182_s3 + $0x88] sm:$0xf0] }
 0x198   :  { %693 = vst [vmem:[#allocation1 + $0x3] ss:$9 sm:$0xff] %v651_v36  ;;  %v710_v39 = vunpack.i.h.s16 %v705_v38  ;;  %1065 = vmatpush.bf16.msrb.mxu2 %v2256_v4  ;;  %v2260_v36 = vor.u32 %v2655_v30, %v2257_v31 }
 0x199   :  { %687 = vst [vmem:[#allocation1] ss:$9 sm:$0xff] %v670_v35 }
 0x19a   :  { %v2123_v40 = vpack.c.b16 %v710_v39, %v705_v38 }
 0x19b   :  { %1088 = vmatpush.bf16.msra.mxu0 %v2284_v55  ;;  %1077 = vmatpush.bf16.msrb.mxu3 %v2204_v18  ;;  %v2702_v18 = vld [vmem:[%s4184_s5 + $0x74] sm:$0xf0] }
 0x19c   :  { %v716_v19 = vrot.slane %v2123_v40, 2 }
 0x19e   :  { %v3343_v58 = vsel %vm718_vm15, %v2123_v40, %v716_v19  ;;  %v726_v59 = vsel %vm725_vm1, %v2123_v40, %v716_v19 }
 0x19f   :  { %v728_v1 = vrot.slane %v726_v59, 2  ;;  %v739_v3 = vshrl.u32 %v3343_v58, 16  ;;  %v742_v2 = vshll.u32 %v3343_v58, 16  ;;  %1089 = vmatpush.bf16.msra.mxu0 %v2276_v13  ;;  %1078 = vmatpush.bf16.msrb.mxu3 %v2196_v32  ;;  %v1099_v59 = vperm.slane %v1097_v56, 0  ;;  %v2725_v32 = vld [vmem:[%s4184_s5 + $0x134] sm:$0xf] }
 0x1a0   :  { %v694_v6 = vld [vmem:[#allocation1] sm:$0xff] }
 0x1a1   :  { %v701_v7 = vsel %vm3293_vm13, 0, %v694_v6  ;;  %v741_v9 = vrot.slane %v739_v3, 6  ;;  %v744_v10 = vrot.slane %v742_v2, 7  ;;  %v748_v11 = vshll.u32 %v728_v1, 16 }
 0x1a2   :  { %v707_v12 = vsel %vm702_vm14, %v701_v7, 0 }
 0x1a3   :  { %v714_v16 = vunpack.i.h.s16 %v707_v12  ;;  %v745_v17 = vor.u32 %v744_v10, %v741_v9  ;;  %v750_v29 = vrot.slane %v748_v11, 7  ;;  %1090 = vmatpush.bf16.msra.mxu0 %v2268_v23  ;;  %v2726_v9 = vld [vmem:[%s4184_s5 + $0x134] sm:$0xf0] }
 0x1a4   :  { %v2722_v23 = vld [vmem:[%s4184_s5 + $0x114] sm:$0xf0] }
 0x1a5   :  { %v2124_v26 = vpack.c.b16 %v714_v16, %v707_v12  ;;  %v746_v28 = vrot.slane %v745_v17, 2  ;;  %v2378_v12 = vor.u32 %v2726_v9, %v2377_v8  ;;  %v2370_v16 = vor.u32 %v2724_v15, %v2369_v14  ;;  %v2475_v17 = vld [vmem:[%s4184_s5 + $0x70] sm:$0xf] }
 0x1a6   :  { %v2476_v20 = vor.u32 %v2702_v18, %v2475_v17  ;;  %v2362_v25 = vor.u32 %v2722_v23, %v2361_v21  ;;  %v2355_v17 = vld [vmem:[%s4184_s5 + $0x108] sm:$0xf0]  ;;  %v2329_v23 = vld [vmem:[%s4184_s5 + $0xd0] sm:$0xf] }
 0x1a7   :  { %v717_v33 = vrot.slane %v2124_v26, 2  ;;  %v751_v34 = vsel %vm3388_vm9, %v746_v28, %v750_v29  ;;  %1091 = vmatpush.bf16.msra.mxu0 %v2260_v36  ;;  %1374 = vmatpush.bf16.msra.mxu1 %v2378_v12  ;;  %v2700_v28 = vld [vmem:[%s4184_s5 + $0x64] sm:$0xf0]  ;;  %v2694_v12 = vld [vmem:[%s4184_s5 + $0x34] sm:$0xf0] }
 0x1a8   :  { %766 = vst [vmem:[#allocation1] ss:$4 sm:$0xff] %v751_v34 }
 0x1a9   :  { %v724_v37 = vsel %vm718_vm15, %v2124_v26, %v717_v33  ;;  %v729_v35 = vsel %vm725_vm1, %v2124_v26, %v717_v33  ;;  %v2467_v26 = vld [vmem:[%s4184_s5 + $0x60] sm:$0xf]  ;;  %v2379_v33 = vld [vmem:[%s4184_s5 + $0x138] sm:$0xf0] }
 0x1aa   :  { %v731_v38 = vrot.slane %v729_v35, 2  ;;  %v752_v39 = vshrl.u32 %v724_v37, 16  ;;  %v755_v40 = vshll.u32 %v724_v37, 16  ;;  %v2468_v31 = vor.u32 %v2700_v28, %v2467_v26  ;;  %v2353_v35 = vld [vmem:[%s4184_s5 + $0x100] sm:$0xf] }
 0x1ab   :  { %1375 = vmatpush.bf16.msra.mxu1 %v2370_v16  ;;  %v2382_v36 = vor.u32 %v2725_v32, %v2379_v33  ;;  %v2719_v16 = vld [vmem:[%s4184_s5 + $0x104] sm:$0xf]  ;;  %v2393_v26 = vld [vmem:[%s4184_s5 + $0x150] sm:$0xf] }
 0x1ac   :  { %v754_v41 = vrot.slane %v752_v39, 6  ;;  %v757_v42 = vrot.slane %v755_v40, 7  ;;  %v761_v43 = vshll.u32 %v731_v38, 16  ;;  %v2720_v38 = vld [vmem:[%s4184_s5 + $0x104] sm:$0xf0]  ;;  %v2358_v21 = vor.u32 %v2719_v16, %v2355_v17 }
 0x1ad   :  { %v2459_v39 = vld [vmem:[%s4184_s5 + $0x50] sm:$0xf]  ;;  %v2354_v40 = vor.u32 %v2720_v38, %v2353_v35  ;;  %v2395_v16 = vld [vmem:[%s4184_s5 + $0x158] sm:$0xf0] }
 0x1ae   :  { %v758_v44 = vor.u32 %v757_v42, %v754_v41  ;;  %v763_v46 = vrot.slane %v761_v43, 7  ;;  %v2698_v41 = vld [vmem:[%s4184_s5 + $0x54] sm:$0xf0]  ;;  %v2723_v42 = vld [vmem:[%s4184_s5 + $0x124] sm:$0xf] }
 0x1af   :  { %1376 = vmatpush.bf16.msra.mxu1 %v2362_v25  ;;  %v2371_v43 = vld [vmem:[%s4184_s5 + $0x128] sm:$0xf0]  ;;  %v2714_v25 = vld [vmem:[%s4184_s5 + $0xd4] sm:$0xf0]  ;;  %v2491_v17 = vld [vmem:[%s4184_s5 + $0x90] sm:$0xf] }
 0x1b0   :  { %v759_v45 = vrot.slane %v758_v44, 2  ;;  %v2460_v44 = vor.u32 %v2698_v41, %v2459_v39  ;;  %v2330_v28 = vor.u32 %v2714_v25, %v2329_v23  ;;  %v2712_v41 = vld [vmem:[%s4184_s5 + $0xc4] sm:$0xf0]  ;;  %v2711_v23 = vld [vmem:[%s4184_s5 + $0xc4] sm:$0xf] }
 0x1b2   :  { %v764_v47 = vsel %vm3388_vm9, %v759_v45, %v763_v46  ;;  %v2374_v45 = vor.u32 %v2723_v42, %v2371_v43  ;;  %v2385_v42 = vld [vmem:[%s4184_s5 + $0x140] sm:$0xf] }
 0x1b3   :  { %769 = vst [vmem:[#allocation1 + $0x1] ss:$4 sm:$0xff] %v764_v47  ;;  %1377 = vmatpush.bf16.msra.mxu1 %v2354_v40  ;;  %v2345_v47 = vld [vmem:[%s4184_s5 + $0xf0] sm:$0xf]  ;;  %v2321_v40 = vld [vmem:[%s4184_s5 + $0xc0] sm:$0xf] }
 0x1ba   :  { %v770_v19 = vld.sshfl [vmem:[#allocation1] sm:$0xff pattern:$0x73625140] }
 0x1bb   :  { %860 = vmatmul.bf16.vlgmr.msra.gmra.mxu3 %v770_v19  ;;  %878 = vst [vmem:[#allocation1] ss:$4 sm:$0xff] %v3343_v58  ;;  %873 = vmatmul.bf16.vlgmr.msrb.gmra.mxu0 %v770_v19  ;;  %v2718_v19 = vld [vmem:[%s4184_s5 + $0xf4] sm:$0xf0] }
 0x1bc   :  { %880 = vst [vmem:[#allocation1 + $0x1] ss:$4 sm:$0xff] %v724_v37  ;;  %1554 = vmatpush.bf16.msrb.mxu0 %v2476_v20  ;;  %1400 = vmatpush.bf16.msra.mxu3 %v2382_v36  ;;  %v2717_v36 = vld [vmem:[%s4184_s5 + $0xf4] sm:$0xf] }
 0x1c0   :  { %1555 = vmatpush.bf16.msrb.mxu0 %v2468_v31  ;;  %1401 = vmatpush.bf16.msra.mxu3 %v2374_v45  ;;  %v2728_v45 = vld [vmem:[%s4184_s5 + $0x144] sm:$0xf0] }
 0x1c3   :  { %v881_v48 = vld.sshfl [vmem:[#allocation1] sm:$0xff pattern:$0x73625140]  ;;  %v882_v50 = vld.sshfl [vmem:[#allocation1 + $0x8] sm:$0xff pattern:$0x73625140] }
 0x1c4   :  { %1053 = vmatmul.bf16.vlgmr.msrb.gmra.mxu1 %v881_v48  ;;  %1066 = vmatmul.bf16.vlgmr.msrb.gmra.mxu2 %v882_v50 }
 0x1c5   :  { %1556 = vmatpush.bf16.msrb.mxu0 %v2460_v44  ;;  %v2322_v44 = vor.u32 %v2712_v41, %v2321_v40 }
 0x1cb   :  { %1079 = vmatmul.bf16.vlgmr.msrb.gmra.mxu3 %v881_v48  ;;  %1092 = vmatmul.bf16.vlgmr.msra.gmra.mxu0 %v882_v50  ;;  %v2409_v48 = vld [vmem:[%s4184_s5 + $0x170] sm:$0xf]  ;;  %v2346_v50 = vor.u32 %v2718_v19, %v2345_v47  ;;  %v2411_v47 = vld [vmem:[%s4184_s5 + $0x178] sm:$0xf0] }
 0x1cd   :  { %1378 = vmatpush.bf16.msra.mxu1 %v2346_v50  ;;  %v2386_v50 = vor.u32 %v2728_v45, %v2385_v42  ;;  %v2709_v42 = vld [vmem:[%s4184_s5 + $0xb4] sm:$0xf] }
 0x238   :  { %v874_v51 = vpop.f32.mrf.mxu0 }
 0x23e   :  { %v861_v52 = vpop.f32.mrf.mxu3 }
 0x240   :  { %v876_v53 = vpop.f32.mrf.mxu0 }
 0x241   :  { %v1054_v55 = vpop.f32.mrf.mxu1  ;;  %v2696_v53 = vld [vmem:[%s4184_s5 + $0x44] sm:$0xf0] }
 0x242   :  { %v1055_v49 = vadd.f32 %v1054_v55, %v861_v52  ;;  %v2451_v52 = vld [vmem:[%s4184_s5 + $0x40] sm:$0xf] }
 0x246   :  { %v863_v57 = vpop.f32.mrf.mxu3 }
 0x247   :  { %v1067_v58 = vpop.f32.mrf.mxu2  ;;  %v2721_v57 = vld [vmem:[%s4184_s5 + $0x114] sm:$0xf] }
 0x248   :  { %v1068_v60 = vadd.f32 %v1067_v58, %v1055_v49  ;;  %v1093_v62 = vpop.f32.mrf.mxu0  ;;  %v2452_v49 = vor.u32 %v2696_v53, %v2451_v52  ;;  %v2427_v52 = vld [vmem:[%s4184_s5 + $0x10] sm:$0xf]  ;;  %v2690_v53 = vld [vmem:[%s4184_s5 + $0x14] sm:$0xf0] }
 0x249   :  { %v1056_v63 = vpop.f32.mrf.mxu1 }
 0x24a   :  { %v3414_v0 = vadd.f32 %v1099_v59, %v1068_v60  ;;  %v2363_v59 = vld [vmem:[%s4184_s5 + $0x118] sm:$0xf0]  ;;  %1557 = vmatpush.bf16.msrb.mxu0 %v2452_v49  ;;  %v2339_v49 = vld [vmem:[%s4184_s5 + $0xe8] sm:$0xf0] }
 0x24c   :  { %v2317_v1 = vmul.f32 -1.442695, %v3414_v0 }
 0x24e   :  { %2779 = vpow2.f32 %v2317_v1  ;;  %v1080_v3 = vpop.f32.mrf.mxu3 }
 0x24f   :  { %v1069_v2 = vpop.f32.mrf.mxu2  ;;  %v1081_v4 = vadd.f32 %v1080_v3, %v874_v51  ;;  %v2734_v51 = vld [vmem:[%s4184_s5 + $0x174] sm:$0xf0]  ;;  %v2337_v3 = vld [vmem:[%s4184_s5 + $0xe0] sm:$0xf] }
 0x250   :  { %v1095_v6 = vpop.f32.mrf.mxu0  ;;  %v2410_v56 = vor.u32 %v2734_v51, %v2409_v48  ;;  %v2716_v2 = vld [vmem:[%s4184_s5 + $0xe4] sm:$0xf0] }
 0x251   :  { %v1094_v61 = vadd.f32 %v1093_v62, %v1081_v4  ;;  %v2366_v62 = vor.u32 %v2721_v57, %v2363_v59  ;;  %v2401_v6 = vld [vmem:[%s4184_s5 + $0x160] sm:$0xf] }
 0x252   :  { %1391 = vmatpush.bf16.msra.mxu2 %v2410_v56  ;;  %v2428_v56 = vor.u32 %v2690_v53, %v2427_v52 }
 0x253   :  { %v3417_v54 = vadd.f32 %v1100_v5, %v1094_v61  ;;  %1402 = vmatpush.bf16.msra.mxu3 %v2366_v62  ;;  %v2338_v5 = vor.u32 %v2716_v2, %v2337_v3  ;;  %v2732_v61 = vld [vmem:[%s4184_s5 + $0x164] sm:$0xf0]  ;;  %v2403_v62 = vld [vmem:[%s4184_s5 + $0x168] sm:$0xf0]  ;;  %v2499_v2 = vld [vmem:[%s4184_s5 + $0xa0] sm:$0xf] }
 0x254   :  { %v2780_v7 = vpop.eup %2779  ;;  %v2402_v9 = vor.u32 %v2732_v61, %v2401_v6  ;;  %v2688_v3 = vld [vmem:[%s4184_s5 + $0x4] sm:$0xf0] }
 0x255   :  { %v3425_v10 = vadd.f32 1.0, %v2780_v7  ;;  %v2318_v11 = vmul.f32 -1.442695, %v3417_v54  ;;  %1379 = vmatpush.bf16.msra.mxu1 %v2338_v5  ;;  %v2713_v7 = vld [vmem:[%s4184_s5 + $0xd4] sm:$0xf] }
 0x256   :  { %v1082_v13 = vpop.f32.mrf.mxu3  ;;  %1392 = vmatpush.bf16.msra.mxu2 %v2402_v9 }
 0x257   :  { %2781 = vrcp.f32 %v3425_v10  ;;  %v1122_v55 = vand.u32 2147483647, %v3425_v10  ;;  %v1124_v60 = vand.u32 2147483648, %v3425_v10  ;;  %vm1118_vm11 = vweird.f32 %v3425_v10  ;;  %1403 = vmatpush.bf16.msra.mxu3 %v2358_v21  ;;  %v2729_v13 = vld [vmem:[%s4184_s5 + $0x154] sm:$0xf] }
 0x258   :  { %2783 = vpow2.f32 %v2318_v11  ;;  %v2443_v11 = vld [vmem:[%s4184_s5 + $0x30] sm:$0xf]  ;;  %v2398_v21 = vor.u32 %v2729_v13, %v2395_v16 }
 0x259   :  { %vm3528_vm12 = vcmp.eq.f32.partialorder %v1122_v55, 8.507059e+37  ;;  %v2444_v15 = vor.u32 %v2694_v12, %v2443_v11  ;;  %1380 = vmatpush.bf16.msra.mxu1 %v2330_v28  ;;  %v2507_v55 = vld [vmem:[%s4184_s5 + $0xb0] sm:$0xf]  ;;  %v2749_v11 = vld [vmem:[%s4184_s5 + $0x1f4] sm:$0xf] }
 0x25a   :  { %v2577_v12 = vld [vmem:[%s4184_s5 + $0x1f8] sm:$0xf0]  ;;  %v2747_v28 = vld [vmem:[%s4184_s5 + $0x1e4] sm:$0xf] }
 0x25b   :  { %1558 = vmatpush.bf16.msrb.mxu0 %v2444_v15  ;;  %v2580_v15 = vor.u32 %v2749_v11, %v2577_v12  ;;  %v2553_v11 = vld [vmem:[%s4184_s5 + $0x1c8] sm:$0xf0] }
 0x25d   :  { %v3447_v24 = vpop.eup %2781  ;;  %1381 = vmatpush.bf16.msra.mxu1 %v2322_v44 }
 0x25e   :  { %v2784_v29 = vpop.eup %2783  ;;  %v1114_v30 = vmul.f32 %v3447_v24, %v3425_v10  ;;  %vm1119_vm10 = vweird.f32 %v3447_v24  ;;  %v1125_v10 = vor.u32 1.1754944e-38, %v1124_v60  ;;  %v2731_v60 = vld [vmem:[%s4184_s5 + $0x164] sm:$0xf] }
 0x25f   :  { %v3463_v34 = vadd.f32 1.0, %v2784_v29  ;;  %vm3540_vm3 = vmor %vm1118_vm11, %vm1119_vm10  ;;  %v2435_v29 = vld [vmem:[%s4184_s5 + $0x20] sm:$0xf]  ;;  %vm1194_vm10 = vcmask 1042432  }
 0x260   :  { %v1115_v37 = vsub.f32 1.0, %v1114_v30  ;;  %v2692_v30 = vld [vmem:[%s4184_s5 + $0x24] sm:$0xf0]  ;;  %vm3696_vm11 = vmand %vm1194_vm10, %vm1195_vm8 }
 0x261   :  { %2785 = vrcp.f32 %v3463_v34  ;;  %v1137_v4 = vand.u32 2147483647, %v3463_v34  ;;  %v1139_v14 = vand.u32 2147483648, %v3463_v34  ;;  %vm1133_vm5 = vweird.f32 %v3463_v34 }
 0x262   :  { %v1116_v46 = vmul.f32 %v3447_v24, %v1115_v37  ;;  %v2436_v33 = vor.u32 %v2692_v30, %v2435_v29  ;;  %v2347_v37 = vld [vmem:[%s4184_s5 + $0xf8] sm:$0xf0] }
 0x263   :  { %vm1138_vm7 = vcmp.eq.f32.partialorder %v1137_v4, 8.507059e+37  ;;  %v1140_v38 = vor.u32 1.1754944e-38, %v1139_v14  ;;  %v2350_v39 = vor.u32 %v2717_v36, %v2347_v37  ;;  %v2708_v4 = vld [vmem:[%s4184_s5 + $0xa4] sm:$0xf0] }
 0x264   :  { %v1117_v63 = vadd.f32 %v3447_v24, %v1116_v46  ;;  %1559 = vmatpush.bf16.msrb.mxu0 %v2436_v33  ;;  %v2733_v46 = vld [vmem:[%s4184_s5 + $0x174] sm:$0xf]  ;;  %v2500_v61 = vor.u32 %v2708_v4, %v2499_v2  ;;  %v2483_v33 = vld [vmem:[%s4184_s5 + $0x80] sm:$0xf]  ;;  %v2704_v37 = vld [vmem:[%s4184_s5 + $0x84] sm:$0xf0] }
 0x265   :  { %1404 = vmatpush.bf16.msra.mxu3 %v2350_v39  ;;  %v2414_v51 = vor.u32 %v2733_v46, %v2411_v47  ;;  %v2484_v39 = vor.u32 %v2704_v37, %v2483_v33  ;;  %v2501_v4 = vld [vmem:[%s4184_s5 + $0xa8] sm:$0xf0]  ;;  %v2703_v37 = vld [vmem:[%s4184_s5 + $0x84] sm:$0xf] }
 0x266   :  { %v1121_v18 = vsel %vm3540_vm3, %v3447_v24, %v1117_v63  ;;  %v2730_v24 = vld [vmem:[%s4184_s5 + $0x154] sm:$0xf0]  ;;  %v2419_v63 = vld [vmem:[%s4184_s5] sm:$0xf] }
 0x267   :  { %v2786_v58 = vpop.eup %2785  ;;  %v2394_v32 = vor.u32 %v2730_v24, %v2393_v26  ;;  %v1126_v35 = vsel %vm3528_vm12, %v1125_v10, %v1121_v18  ;;  %v2420_v6 = vor.u32 %v2688_v3, %v2419_v63  ;;  %v2706_v18 = vld [vmem:[%s4184_s5 + $0x94] sm:$0xf0]  ;;  %v2323_v26 = vld [vmem:[%s4184_s5 + $0xc8] sm:$0xf0]  ;;  %vm1959_vm12 = vcmask 31744  }
 0x268   :  { %v1129_v1 = vmul.f32 %v2786_v58, %v3463_v34  ;;  %vm1134_vm4 = vweird.f32 %v2786_v58  ;;  %v1143_v19 = vmul.f32 %v1126_v35, %v3414_v0  ;;  %v2710_v0 = vld [vmem:[%s4184_s5 + $0xb4] sm:$0xf0]  ;;  %1560 = vmatpush.bf16.msrb.mxu0 %v2428_v56  ;;  %v2492_v25 = vor.u32 %v2706_v18, %v2491_v17  ;;  %v2569_v24 = vld [vmem:[%s4184_s5 + $0x1e8] sm:$0xf0]  ;;  %v2493_v18 = vld [vmem:[%s4184_s5 + $0x98] sm:$0xf0] }
 0x269   :  { %vm1135_vm6 = vmor %vm1133_vm5, %vm1134_vm4  ;;  %1393 = vmatpush.bf16.msra.mxu2 %v2394_v32  ;;  %v2508_v59 = vor.u32 %v2710_v0, %v2507_v55  ;;  %v2326_v29 = vor.u32 %v2711_v23, %v2323_v26  ;;  %v2572_v30 = vor.u32 %v2747_v28, %v2569_v24  ;;  %v2387_v32 = vld [vmem:[%s4184_s5 + $0x148] sm:$0xf0]  ;;  %v2496_v23 = vor.u32 %v2705_v27, %v2493_v18  ;;  %v2741_v24 = vld [vmem:[%s4184_s5 + $0x1b4] sm:$0xf] }
 0x26a   :  { %v1130_v8 = vsub.f32 1.0, %v1129_v1  ;;  %v2406_v1 = vor.u32 %v2731_v60, %v2403_v62  ;;  %v2701_v0 = vld [vmem:[%s4184_s5 + $0x74] sm:$0xf]  ;;  %v2559_v18 = vld [vmem:[%s4184_s5 + $0x1d0] sm:$0xf] }
 0x26b   :  { %1571 = vmatpush.bf16.msrb.mxu1 %v2508_v59  ;;  %v2561_v59 = vld [vmem:[%s4184_s5 + $0x1d8] sm:$0xf0] }
 0x26c   :  { %v1131_v20 = vmul.f32 %v2786_v58, %v1130_v8  ;;  %v2331_v8 = vld [vmem:[%s4184_s5 + $0xd8] sm:$0xf0]  ;;  %1561 = vmatpush.bf16.msrb.mxu0 %v2420_v6 }
 0x26d   :  { %1394 = vmatpush.bf16.msra.mxu2 %v2386_v50  ;;  %v2334_v9 = vor.u32 %v2713_v7, %v2331_v8 }
 0x26e   :  { %v1132_v31 = vadd.f32 %v2786_v58, %v1131_v20 }
 0x26f   :  { %1572 = vmatpush.bf16.msrb.mxu1 %v2500_v61  ;;  %v2743_v61 = vld [vmem:[%s4184_s5 + $0x1c4] sm:$0xf] }
 0x270   :  { %v1136_v34 = vsel %vm1135_vm6, %v2786_v58, %v1132_v31  ;;  %1778 = vmatpush.bf16.msra.mxu0 %v2580_v15  ;;  %v2727_v31 = vld [vmem:[%s4184_s5 + $0x144] sm:$0xf] }
 0x271   :  { %v1141_v43 = vsel %vm1138_vm7, %v1140_v38, %v1136_v34  ;;  %1417 = vmatpush.bf16.msrb.mxu2 %v2414_v51  ;;  %v2390_v36 = vor.u32 %v2727_v31, %v2387_v32  ;;  %v2545_v32 = vld [vmem:[%s4184_s5 + $0x1b8] sm:$0xf0] }
 0x272   :  { %v1144_v48 = vmul.f32 %v1141_v43, %v3417_v54  ;;  %v2715_v54 = vld [vmem:[%s4184_s5 + $0xe4] sm:$0xf] }
 0x273   :  { %v2342_v58 = vor.u32 %v2715_v54, %v2339_v49  ;;  %1573 = vmatpush.bf16.msrb.mxu1 %v2492_v25  ;;  %v2745_v54 = vld [vmem:[%s4184_s5 + $0x1d4] sm:$0xf] }
 0x274   :  { %v1145_v57 = vpack.c.bf16 %v1144_v48, %v1143_v19  ;;  %1779 = vmatpush.bf16.msra.mxu0 %v2572_v30  ;;  %v2509_v48 = vld [vmem:[%s4184_s5 + $0xb8] sm:$0xf0]  ;;  %v2564_v63 = vor.u32 %v2745_v54, %v2561_v59  ;;  %v2758_v59 = vld [vmem:[%s4184_s5 + $0x234] sm:$0xf0] }
 0x275   :  { %1405 = vmatpush.bf16.msra.mxu3 %v2342_v58  ;;  %1418 = vmatpush.bf16.msrb.mxu2 %v2406_v1  ;;  %v2512_v51 = vor.u32 %v2709_v42, %v2509_v48  ;;  %v2707_v1 = vld [vmem:[%s4184_s5 + $0xa4] sm:$0xf]  ;;  %v2477_v54 = vld [vmem:[%s4184_s5 + $0x78] sm:$0xf0] }
 0x276   :  { %v1147_v5 = vrot.slane %v1145_v57, 2  ;;  %v2504_v6 = vor.u32 %v2707_v1, %v2501_v4  ;;  %v2699_v1 = vld [vmem:[%s4184_s5 + $0x64] sm:$0xf] }
 0x277   :  { %1574 = vmatpush.bf16.msrb.mxu1 %v2484_v39 }
 0x278   :  { %v1150_v10 = vsel %vm718_vm15, %v1145_v57, %v1147_v5  ;;  %v1151_v14 = vsel %vm725_vm1, %v1145_v57, %v1147_v5  ;;  %1780 = vmatpush.bf16.msra.mxu0 %v2564_v63  ;;  %v2480_v63 = vor.u32 %v2701_v0, %v2477_v54  ;;  %v2689_v0 = vld [vmem:[%s4184_s5 + $0x14] sm:$0xf]  ;;  %v2429_v54 = vld [vmem:[%s4184_s5 + $0x18] sm:$0xf0] }
 0x279   :  { %v1153_v20 = vrot.slane %v1151_v14, 2  ;;  %1154 = vst [vmem:[#allocation1] ss:$4 sm:$0xff] %v1150_v10  ;;  %1406 = vmatpush.bf16.msra.mxu3 %v2334_v9  ;;  %1419 = vmatpush.bf16.msrb.mxu2 %v2398_v21  ;;  %v2556_v14 = vor.u32 %v2743_v61, %v2553_v11  ;;  %v2599_v61 = vld [vmem:[%s4184_s5 + $0x220] sm:$0xf] }
 0x27b   :  { %1159 = vst [vmem:[#allocation1 + $0x20] ss:$4 sm:$0xff] %v1153_v20 }
 0x27c   :  { %1781 = vmatpush.bf16.msra.mxu0 %v2556_v14 }
 0x27d   :  { %1407 = vmatpush.bf16.msra.mxu3 %v2326_v29  ;;  %1420 = vmatpush.bf16.msrb.mxu2 %v2390_v36 }
 0x280   :  { %v1155_v35 = vld.sshfl [vmem:[#allocation1] sm:$0xff pattern:$0x73625140]  ;;  %v1156_v38 = vld.sshfl [vmem:[#allocation1 + $0x8] sm:$0xff pattern:$0x73625140] }
 0x281   :  { %v1162_v34 = vshrl.u32 %v1155_v35, 16  ;;  %v1165_v40 = vshll.u32 %v1155_v35, 16  ;;  %v1168_v41 = vshrl.u32 %v1156_v38, 16  ;;  %v1171_v47 = vshll.u32 %v1156_v38, 16  ;;  %1597 = vmatpush.bf16.msrb.mxu3 %v2512_v51 }
 0x282   :  { %v1160_v43 = vld.sshfl [vmem:[#allocation1 + $0x20] sm:$0xff pattern:$0x73625140]  ;;  %v1161_v44 = vld.sshfl [vmem:[#allocation1 + $0x28] sm:$0xff pattern:$0x73625140] }
 0x283   :  { %v1164_v45 = vrot.slane %v1162_v34, 7  ;;  %v1170_v46 = vrot.slane %v1168_v41, 7  ;;  %v1174_v19 = vshrl.u32 %v1160_v43, 16  ;;  %v1180_v50 = vshrl.u32 %v1161_v44, 16  ;;  %v2485_v34 = vld [vmem:[%s4184_s5 + $0x88] sm:$0xf0] }
 0x284   :  { %v1177_v56 = vshll.u32 %v1160_v43, 16  ;;  %v1183_v57 = vshll.u32 %v1161_v44, 16  ;;  %v2548_v41 = vor.u32 %v2741_v24, %v2545_v32  ;;  %v2488_v43 = vor.u32 %v2703_v37, %v2485_v34  ;;  %v2739_v44 = vld [vmem:[%s4184_s5 + $0x1a4] sm:$0xf] }
 0x285   :  { %v1167_v52 = vor.u32 %v1165_v40, %v1164_v45  ;;  %v1173_v53 = vor.u32 %v1171_v47, %v1170_v46  ;;  %v1176_v55 = vrot.slane %v1174_v19, 7  ;;  %v1182_v49 = vrot.slane %v1180_v50, 7  ;;  %1598 = vmatpush.bf16.msrb.mxu3 %v2504_v6  ;;  %v2537_v45 = vld [vmem:[%s4184_s5 + $0x1a8] sm:$0xf0] }
 0x286   :  { %1782 = vmatpush.bf16.msra.mxu0 %v2548_v41  ;;  %v2540_v19 = vor.u32 %v2739_v44, %v2537_v45  ;;  %v2445_v44 = vld [vmem:[%s4184_s5 + $0x38] sm:$0xf0] }
 0x287   :  { %v1179_v58 = vor.u32 %v1177_v56, %v1176_v55  ;;  %v1190_v60 = vsel %vm3293_vm13, 0, %v1167_v52  ;;  %v1191_v62 = vsel %vm3293_vm13, 0, %v1173_v53  ;;  %v1185_v3 = vor.u32 %v1183_v57, %v1182_v49  ;;  %v2737_v52 = vld [vmem:[%s4184_s5 + $0x194] sm:$0xf]  ;;  %v2529_v55 = vld [vmem:[%s4184_s5 + $0x198] sm:$0xf0] }
 0x288   :  { %v1198_v2 = vsel %vm3696_vm11, %v1191_v62, 0  ;;  %v1197_v9 = vsel %vm3696_vm11, %v1190_v60, 0  ;;  %v2532_v56 = vor.u32 %v2737_v52, %v2529_v55  ;;  %v2750_v49 = vld [vmem:[%s4184_s5 + $0x1f4] sm:$0xf0]  ;;  %v2607_v57 = vld [vmem:[%s4184_s5 + $0x230] sm:$0xf] }
 0x289   :  { %v1203_v5 = vrot.slane %v1198_v2, 6  ;;  %v1192_v7 = vsel %vm3293_vm13, 0, %v1179_v58  ;;  %v1193_v8 = vsel %vm3293_vm13, 0, %v1185_v3  ;;  %1599 = vmatpush.bf16.msrb.mxu3 %v2496_v23  ;;  %vm3810_vm13 = vmor %vm285_vm0, %vm294_vm2  ;;  %v2735_v60 = vld [vmem:[%s4184_s5 + $0x184] sm:$0xf]  ;;  %v2576_v4 = vor.u32 %v2750_v49, %v2575_v22 }
 0x28a   :  { %v1200_v12 = vsel %vm3696_vm11, %v1193_v8, 0  ;;  %v1199_v20 = vsel %vm3696_vm11, %v1192_v7, 0  ;;  %1783 = vmatpush.bf16.msra.mxu0 %v2540_v19  ;;  %v2521_v62 = vld [vmem:[%s4184_s5 + $0x188] sm:$0xf0]  ;;  %v2567_v2 = vld [vmem:[%s4184_s5 + $0x1e0] sm:$0xf]  ;;  %v2608_v6 = vor.u32 %v2758_v59, %v2607_v57  ;;  %v2432_v57 = vor.u32 %v2689_v0, %v2429_v54 }
 0x28b   :  { %v3733_v13 = vsel %vm718_vm15, %v1197_v9, %v1203_v5  ;;  %v3736_v10 = vsel %vm725_vm1, %v1197_v9, %v1203_v5  ;;  %v1204_v15 = vrot.slane %v1200_v12, 6  ;;  %v2469_v3 = vld [vmem:[%s4184_s5 + $0x68] sm:$0xf0]  ;;  %v2748_v5 = vld [vmem:[%s4184_s5 + $0x1e4] sm:$0xf0]  ;;  %v2524_v11 = vor.u32 %v2735_v60, %v2521_v62 }
 0x28c   :  { %v1213_v16 = vrot.slane %v3736_v10, 2  ;;  %v1217_v17 = vshrl.u32 %v3733_v13, 16  ;;  %v1220_v21 = vshll.u32 %v3733_v13, 16  ;;  %v2756_v7 = vld [vmem:[%s4184_s5 + $0x224] sm:$0xf0]  ;;  %vm1612_vm2 = vcmask 1046534  }
 0x28d   :  { %v3750_v25 = vsel %vm718_vm15, %v1199_v20, %v1204_v15  ;;  %v3753_v26 = vsel %vm725_vm1, %v1199_v20, %v1204_v15  ;;  %1600 = vmatpush.bf16.msrb.mxu3 %v2488_v43  ;;  %vm1610_vm15 = vcmask 1044484   ;;  %vm1371_vm1 = vcmask 523264   ;;  %v2697_v15 = vld [vmem:[%s4184_s5 + $0x54] sm:$0xf]  ;;  %v2591_v23 = vld [vmem:[%s4184_s5 + $0x210] sm:$0xf] }
 0x28e   :  { %v1219_v28 = vrot.slane %v1217_v17, 6  ;;  %v1216_v29 = vrot.slane %v3753_v26, 2  ;;  %v1230_v30 = vshrl.u32 %v3750_v25, 16  ;;  %v1233_v31 = vshll.u32 %v3750_v25, 16  ;;  %1784 = vmatpush.bf16.msra.mxu0 %v2532_v56  ;;  %vm3846_vm0 = vmor %vm3810_vm13, %vm1610_vm15  ;;  %v2461_v17 = vld [vmem:[%s4184_s5 + $0x58] sm:$0xf0] }
 0x28f   :  { %v1222_v33 = vrot.slane %v1220_v21, 7  ;;  %v1226_v36 = vshll.u32 %v1213_v16, 16  ;;  %v2472_v14 = vor.u32 %v2699_v1, %v2469_v3  ;;  %v2568_v27 = vor.u32 %v2748_v5, %v2567_v2  ;;  %v2746_v21 = vld [vmem:[%s4184_s5 + $0x1d4] sm:$0xf0]  ;;  %v2695_v10 = vld [vmem:[%s4184_s5 + $0x44] sm:$0xf] }
 0x290   :  { %v1232_v35 = vrot.slane %v1230_v30, 6  ;;  %v1235_v38 = vrot.slane %v1233_v31, 7  ;;  %v1239_v39 = vshll.u32 %v1216_v29, 16  ;;  %v2600_v20 = vor.u32 %v2756_v7, %v2599_v61  ;;  %v2744_v26 = vld [vmem:[%s4184_s5 + $0x1c4] sm:$0xf0] }
 0x291   :  { %v1223_v40 = vor.u32 %v1222_v33, %v1219_v28  ;;  %v1228_v47 = vrot.slane %v1226_v36, 7  ;;  %v2754_v28 = vld [vmem:[%s4184_s5 + $0x214] sm:$0xf0]  ;;  %v1616_v24 = vrot.slane %v1213_v16, 7  ;;  %v2515_v31 = vrot.slane %v3733_v13, 9 }
 0x292   :  { %v1236_v42 = vor.u32 %v1235_v38, %v1232_v35  ;;  %v1241_v48 = vrot.slane %v1239_v39, 7  ;;  %1785 = vmatpush.bf16.msra.mxu0 %v2524_v11  ;;  %v2516_v32 = vrot.slane %v3750_v25, 9  ;;  %v1620_v33 = vrot.slane %v1216_v29, 7  ;;  %v2453_v16 = vld [vmem:[%s4184_s5 + $0x48] sm:$0xf0] }
 0x293   :  { %v1224_v46 = vrot.slane %v1223_v40, 2  ;;  %v2464_v36 = vor.u32 %v2697_v15, %v2461_v17  ;;  %v2560_v37 = vor.u32 %v2746_v21, %v2559_v18  ;;  %v2583_v29 = vld [vmem:[%s4184_s5 + $0x200] sm:$0xf]  ;;  %v2752_v35 = vld [vmem:[%s4184_s5 + $0x204] sm:$0xf0]  ;;  %v2456_v41 = vor.u32 %v2695_v10, %v2453_v16 }
 0x294   :  { %v1237_v50 = vrot.slane %v1236_v42, 2  ;;  %v2693_v43 = vld [vmem:[%s4184_s5 + $0x34] sm:$0xf]  ;;  %v2584_v45 = vor.u32 %v2752_v35, %v2583_v29  ;;  %v2535_v52 = vld [vmem:[%s4184_s5 + $0x1a0] sm:$0xf] }
 0x295   :  { %v1229_v51 = vsel %vm3388_vm9, %v1224_v46, %v1228_v47  ;;  %v2543_v46 = vld [vmem:[%s4184_s5 + $0x1b0] sm:$0xf]  ;;  %v2742_v47 = vld [vmem:[%s4184_s5 + $0x1b4] sm:$0xf0]  ;;  %v2448_v19 = vor.u32 %v2693_v43, %v2445_v44  ;;  %v2687_v58 = vld [vmem:[%s4184_s5 + $0x4] sm:$0xf] }
 0x296   :  { %v1242_v53 = vsel %vm3388_vm9, %v1237_v50, %v1241_v48  ;;  %1244 = vst [vmem:[#allocation1] ss:$4 sm:$0xff] %v1229_v51  ;;  %vm3874_vm9 = vmor %vm3846_vm0, %vm1612_vm2  ;;  %v2544_v48 = vor.u32 %v2742_v47, %v2543_v46  ;;  %v2691_v50 = vld [vmem:[%s4184_s5 + $0x24] sm:$0xf]  ;;  %v2437_v51 = vld [vmem:[%s4184_s5 + $0x28] sm:$0xf0] }
 0x297   :  { %1247 = vst [vmem:[#allocation1 + $0x1] ss:$4 sm:$0xff] %v1242_v53  ;;  %v1617_v38 = vsel %vm3874_vm9, %v2515_v31, %v1616_v24  ;;  %v1621_v40 = vsel %vm3874_vm9, %v2516_v32, %v1620_v33  ;;  %v2740_v53 = vld [vmem:[%s4184_s5 + $0x1a4] sm:$0xf0]  ;;  %v2440_v55 = vor.u32 %v2691_v50, %v2437_v51  ;;  %v2527_v22 = vld [vmem:[%s4184_s5 + $0x190] sm:$0xf] }
 0x298   :  { %v2536_v56 = vor.u32 %v2740_v53, %v2535_v52  ;;  %v2738_v49 = vld [vmem:[%s4184_s5 + $0x194] sm:$0xf0]  ;;  %v2421_v60 = vld [vmem:[%s4184_s5 + $0x8] sm:$0xf0]  ;;  %v2519_v62 = vld [vmem:[%s4184_s5 + $0x180] sm:$0xf] }
 0x299   :  { %v2528_v59 = vor.u32 %v2738_v49, %v2527_v22  ;;  %v2757_v1 = vld [vmem:[%s4184_s5 + $0x234] sm:$0xf]  ;;  %v2609_v3 = vld [vmem:[%s4184_s5 + $0x238] sm:$0xf0]  ;;  %v2755_v61 = vld [vmem:[%s4184_s5 + $0x224] sm:$0xf] }
 0x29a   :  { %v2601_v7 = vld [vmem:[%s4184_s5 + $0x228] sm:$0xf0]  ;;  %v2593_v11 = vld [vmem:[%s4184_s5 + $0x218] sm:$0xf0] }
 0x29b   :  { %v2585_v15 = vld [vmem:[%s4184_s5 + $0x208] sm:$0xf0] }
 0x29e   :  { %v1248_v8 = vld.sshfl [vmem:[#allocation1] sm:$0xff pattern:$0x73625140]  ;;  %v3838_v9 = vld.sshfl [vmem:[#allocation1 + $0x8] sm:$0xff pattern:$0x73625140] }
 0x29f   :  { %1382 = vmatmul.bf16.vlgmr.msra.gmra.mxu1 %v1248_v8  ;;  %2415 = vmatmul.msk.bf16.vlgmr.msra.gmra.mxu2 %vm1371_vm1, %v3838_v9  ;;  %1426 = vst [vmem:[#allocation1] ss:$4 sm:$0xff] %v3733_v13  ;;  %v2551_v13 = vld [vmem:[%s4184_s5 + $0x1c0] sm:$0xf] }
 0x2a0   :  { %1428 = vst [vmem:[#allocation1 + $0x1] ss:$4 sm:$0xff] %v3750_v25  ;;  %1408 = vmatmul.bf16.vlgmr.msra.gmra.mxu3 %v1248_v8  ;;  %1580 = vmatpush.bf16.msra.mxu2 %v2480_v63  ;;  %v2592_v25 = vor.u32 %v2754_v28, %v2591_v23  ;;  %v2552_v42 = vor.u32 %v2744_v26, %v2551_v13  ;;  %v2736_v63 = vld [vmem:[%s4184_s5 + $0x184] sm:$0xf0] }
 0x2a1   :  { %1752 = vmatpush.bf16.msra.mxu1 %v2576_v4  ;;  %1769 = vmatpush.bf16.msra.mxu3 %v2608_v6  ;;  %v2424_v4 = vor.u32 %v2687_v58, %v2421_v60  ;;  %v2520_v5 = vor.u32 %v2736_v63, %v2519_v62  ;;  %v2612_v6 = vor.u32 %v2757_v1, %v2609_v3 }
 0x2a2   :  { %v2604_v8 = vor.u32 %v2755_v61, %v2601_v7 }
 0x2a4   :  { %1581 = vmatpush.bf16.msra.mxu2 %v2472_v14 }
 0x2a5   :  { %1753 = vmatpush.bf16.msra.mxu1 %v2568_v27  ;;  %1770 = vmatpush.bf16.msra.mxu3 %v2600_v20  ;;  %v2751_v27 = vld [vmem:[%s4184_s5 + $0x204] sm:$0xf] }
 0x2a6   :  { %v2588_v17 = vor.u32 %v2751_v27, %v2585_v15 }
 0x2a7   :  { %v1429_v39 = vld.sshfl [vmem:[#allocation1] sm:$0xff pattern:$0x73625140]  ;;  %v1430_v34 = vld.sshfl [vmem:[#allocation1 + $0x8] sm:$0xff pattern:$0x73625140] }
 0x2a8   :  { %1562 = vmatmul.bf16.vlgmr.msrb.gmra.mxu0 %v1429_v39  ;;  %1582 = vmatpush.bf16.msra.mxu2 %v2464_v36  ;;  %1623 = vst [vmem:[#allocation1] ss:$4 sm:$0xff] %v1617_v38 }
 0x2a9   :  { %1754 = vmatpush.bf16.msra.mxu1 %v2560_v37  ;;  %1626 = vst [vmem:[#allocation1 + $0x1] ss:$4 sm:$0xff] %v1621_v40  ;;  %1771 = vmatpush.bf16.msra.mxu3 %v2592_v25 }
 0x2ac   :  { %1583 = vmatpush.bf16.msra.mxu2 %v2456_v41 }
 0x2ad   :  { %1755 = vmatpush.bf16.msra.mxu1 %v2552_v42  ;;  %1772 = vmatpush.bf16.msra.mxu3 %v2584_v45  ;;  %v1806_v45 = vld [vmem:[%s4185_s6] sm:$0x3] }
 0x2ae   :  { %v1809_v50 = vperm.slane %v1806_v45, 1  ;;  %v1808_v52 = vperm.slane %v1806_v45, 0 }
 0x2af   :  { %2416 = vmatmul.msk.bf16.vlgmr.msrb.gmra.mxu2 %vm1371_vm1, %v3838_v9  ;;  %2513 = vmatmul.msk.bf16.vlgmr.msrb.gmra.mxu1 %vm1371_vm1, %v1430_v34  ;;  %v2753_v9 = vld [vmem:[%s4184_s5 + $0x214] sm:$0xf] }
 0x2b0   :  { %2514 = vmatmul.msk.bf16.vlgmr.msrb.gmra.mxu3 %vm1371_vm1, %v1430_v34  ;;  %1584 = vmatpush.bf16.msra.mxu2 %v2448_v19  ;;  %v1627_v2 = vld.sshfl [vmem:[#allocation1] sm:$0xff pattern:$0x73625140]  ;;  %v1628_v12 = vld.sshfl [vmem:[#allocation1 + $0x8] sm:$0xff pattern:$0x73625140]  ;;  %v2596_v14 = vor.u32 %v2753_v9, %v2593_v11 }
 0x2b1   :  { %1756 = vmatpush.bf16.msra.mxu1 %v2544_v48 }
 0x2b4   :  { %1585 = vmatpush.bf16.msra.mxu2 %v2440_v55 }
 0x2b5   :  { %1757 = vmatpush.bf16.msra.mxu1 %v2536_v56 }
 0x2b8   :  { %1786 = vmatmul.bf16.vlgmr.msra.gmra.mxu0 %v1627_v2  ;;  %1586 = vmatpush.bf16.msra.mxu2 %v2432_v57 }
 0x2b9   :  { %1758 = vmatpush.bf16.msra.mxu1 %v2528_v59 }
 0x2bc   :  { %1587 = vmatpush.bf16.msra.mxu2 %v2424_v4 }
 0x2bd   :  { %1759 = vmatpush.bf16.msra.mxu1 %v2520_v5 }
 0x2bf   :  { %1588 = vmatmul.bf16.vlgmr.msra.gmra.mxu2 %v1429_v39 }
 0x2c0   :  { %1795 = vmatpush.bf16.msrb.mxu2 %v2612_v6  ;;  %1760 = vmatmul.bf16.vlgmr.msra.gmra.mxu1 %v1627_v2 }
 0x2c1   :  { %2613 = vmatmul.msk.bf16.vlgmr.msra.gmra.mxu3 %vm1371_vm1, %v1628_v12 }
 0x2c4   :  { %1796 = vmatpush.bf16.msrb.mxu2 %v2604_v8 }
 0x2c8   :  { %1797 = vmatpush.bf16.msrb.mxu2 %v2596_v14 }
 0x2cc   :  { %1798 = vmatpush.bf16.msrb.mxu2 %v2588_v17 }
 0x2cf   :  { %2614 = vmatmul.msk.bf16.vlgmr.msrb.gmra.mxu2 %vm1371_vm1, %v1628_v12 }
 0x31c   :  { %v1383_v18 = vpop.f32.mrf.mxu1 }
 0x322   :  { %v1396_v20 = vpop.f32.mrf.mxu2 }
 0x323   :  { %v1409_v21 = vpop.f32.mrf.mxu3  ;;  %v1397_v40 = vadd.f32 %v1396_v20, %v1383_v18 }
 0x324   :  { %v1385_v23 = vpop.f32.mrf.mxu1 }
 0x325   :  { %v1563_v28 = vpop.f32.mrf.mxu0 }
 0x326   :  { %v1564_v43 = vadd.f32 %v1563_v28, %v1397_v40 }
 0x32a   :  { %v1398_v24 = vpop.f32.mrf.mxu2 }
 0x32b   :  { %v1411_v30 = vpop.f32.mrf.mxu3 }
 0x32c   :  { %v1576_v31 = vpop.f32.mrf.mxu1 }
 0x32d   :  { %v1565_v32 = vpop.f32.mrf.mxu0  ;;  %v1577_v47 = vadd.f32 %v1576_v31, %v1564_v43 }
 0x332   :  { %v1422_v33 = vpop.f32.mrf.mxu2 }
 0x333   :  { %v1602_v36 = vpop.f32.mrf.mxu3  ;;  %v1423_v41 = vadd.f32 %v1422_v33, %v1409_v21 }
 0x334   :  { %v1578_v37 = vpop.f32.mrf.mxu1 }
 0x335   :  { %v1787_v10 = vpop.f32.mrf.mxu0 }
 0x33a   :  { %v1424_v16 = vpop.f32.mrf.mxu2 }
 0x33b   :  { %v1604_v13 = vpop.f32.mrf.mxu3 }
 0x33d   :  { %v1761_v25 = vpop.f32.mrf.mxu1  ;;  %v1789_v26 = vpop.f32.mrf.mxu0 }
 0x342   :  { %v1589_v29 = vpop.f32.mrf.mxu2 }
 0x343   :  { %v1590_v42 = vadd.f32 %v1589_v29, %v1423_v41 }
 0x344   :  { %v1774_v35 = vpop.f32.mrf.mxu3 }
 0x345   :  { %v1763_v38 = vpop.f32.mrf.mxu1  ;;  %v1775_v44 = vadd.f32 %v1774_v35, %v1761_v25  ;;  %v1603_v19 = vadd.f32 %v1602_v36, %v1590_v42 }
 0x347   :  { %v1804_v51 = vadd.f32 %v1775_v44, %v1577_v47 }
 0x349   :  { %v1812_v56 = vadd.f32 %v1808_v52, %v1804_v51 }
 0x34a   :  { %v1591_v39 = vpop.f32.mrf.mxu2 }
 0x34c   :  { %v1776_v34 = vpop.f32.mrf.mxu3 }
 0x352   :  { %v1800_v46 = vpop.f32.mrf.mxu2 }
 0x353   :  { %v1801_v48 = vadd.f32 %v1800_v46, %v1787_v10 }
 0x355   :  { %v1805_v53 = vadd.f32 %v1801_v48, %v1603_v19 }
 0x357   :  { %v1813_v55 = vadd.f32 %v1809_v50, %v1805_v53 }
 0x359   :  { %v1816_v0 = vrot.slane %v1813_v55, 4 }
 0x35a   :  { %v1802_v54 = vpop.f32.mrf.mxu2 }
 0x35b   :  { %v1817_v22 = vsel %vm702_vm14, %v1812_v56, %v1816_v0  ;;  %v1818_v49 = vsel %vm702_vm14, %v1816_v0, %v1812_v56 }
 0x35c   :  { %v1819_v57 = vrot.slane %v1818_v49, 4  ;;  %1820 = vst [vmem:[#allocation1] ss:$2 sm:$0xff] %v1817_v22 }
 0x35e   :  { %1824 = vst [vmem:[#allocation1 + $0x10] ss:$2 sm:$0xff] %v1819_v57 }
 0x363   :  { %v1821_v59 = vld.sshfl [vmem:[#allocation1] sm:$0xff pattern:$0x75316420]  ;;  %v1822_v60 = vld.sshfl [vmem:[#allocation1 + $0x8] sm:$0xff pattern:$0x75316420] }
 0x364   :  { %1831 = vxpose.xlu1.b32.start.end [1/1] (short) %v1821_v59, 128 }
 0x365   :  { %v1825_v58 = vld.sshfl [vmem:[#allocation1 + $0x10] sm:$0xff pattern:$0x75316420]  ;;  %v1826_v62 = vld.sshfl [vmem:[#allocation1 + $0x18] sm:$0xff pattern:$0x75316420] }
 0x366   :  { %1895 = vxpose.xlu2.b32.start.end [1/1] (short) %v1825_v58, 128 }
 0x3e4   :  { %1863 = vxpose.xlu1.b32.start.end [1/1] (short) (narrow) %v1822_v60, 64 }
 0x3e6   :  { %1927 = vxpose.xlu2.b32.start.end [1/1] (short) (narrow) %v1826_v62, 64 }
 0x3ff   :  { %v1911_v63 = vpop.trf.xlu2 }
 0x400   :  { %1984 = vst.msk [vmem:[%s4186_s7 + $0xc0] sm:$0xff] %vm1959_vm12, %v1911_v63 }
 0x407   :  { %v1912_v1 = vpop.trf.xlu2 }
 0x408   :  { %v1847_v3 = vpop.trf.xlu1  ;;  %1985 = vst.msk [vmem:[%s4186_s7 + $0xc8] sm:$0xff] %vm1959_vm12, %v1912_v1 }
 0x409   :  { %1960 = vst.msk [vmem:[%s4186_s7] sm:$0xff] %vm1959_vm12, %v1847_v3 }
 0x40f   :  { %v1913_v2 = vpop.trf.xlu2 }
 0x410   :  { %v1848_v4 = vpop.trf.xlu1  ;;  %1986 = vst.msk [vmem:[%s4186_s7 + $0xd0] sm:$0xff] %vm1959_vm12, %v1913_v2 }
 0x411   :  { %1961 = vst.msk [vmem:[%s4186_s7 + $0x8] sm:$0xff] %vm1959_vm12, %v1848_v4 }
 0x417   :  { %v1914_v5 = vpop.trf.xlu2 }
 0x418   :  { %v1849_v6 = vpop.trf.xlu1  ;;  %1987 = vst.msk [vmem:[%s4186_s7 + $0xd8] sm:$0xff] %vm1959_vm12, %v1914_v5 }
 0x419   :  { %1962 = vst.msk [vmem:[%s4186_s7 + $0x10] sm:$0xff] %vm1959_vm12, %v1849_v6 }
 0x41f   :  { %v1915_v61 = vpop.trf.xlu2 }
 0x420   :  { %v1850_v7 = vpop.trf.xlu1  ;;  %1988 = vst.msk [vmem:[%s4186_s7 + $0xe0] sm:$0xff] %vm1959_vm12, %v1915_v61 }
 0x421   :  { %1963 = vst.msk [vmem:[%s4186_s7 + $0x18] sm:$0xff] %vm1959_vm12, %v1850_v7 }
 0x427   :  { %v1916_v8 = vpop.trf.xlu2 }
 0x428   :  { %v1851_v9 = vpop.trf.xlu1  ;;  %1989 = vst.msk [vmem:[%s4186_s7 + $0xe8] sm:$0xff] %vm1959_vm12, %v1916_v8 }
 0x429   :  { %1964 = vst.msk [vmem:[%s4186_s7 + $0x20] sm:$0xff] %vm1959_vm12, %v1851_v9 }
 0x42f   :  { %v1917_v11 = vpop.trf.xlu2 }
 0x430   :  { %v1852_v12 = vpop.trf.xlu1  ;;  %1990 = vst.msk [vmem:[%s4186_s7 + $0xf0] sm:$0xff] %vm1959_vm12, %v1917_v11 }
 0x431   :  { %1965 = vst.msk [vmem:[%s4186_s7 + $0x28] sm:$0xff] %vm1959_vm12, %v1852_v12 }
 0x437   :  { %v1918_v14 = vpop.trf.xlu2 }
 0x438   :  { %v1853_v27 = vpop.trf.xlu1  ;;  %1991 = vst.msk [vmem:[%s4186_s7 + $0xf8] sm:$0xff] %vm1959_vm12, %v1918_v14 }
 0x439   :  { %1966 = vst.msk [vmem:[%s4186_s7 + $0x30] sm:$0xff] %vm1959_vm12, %v1853_v27 }
 0x43f   :  { %v1919_v15 = vpop.trf.xlu2 }
 0x440   :  { %v1854_v17 = vpop.trf.xlu1  ;;  %1992 = vst.msk [vmem:[%s4186_s7 + $0x100] sm:$0xff] %vm1959_vm12, %v1919_v15 }
 0x441   :  { %1967 = vst.msk [vmem:[%s4186_s7 + $0x38] sm:$0xff] %vm1959_vm12, %v1854_v17 }
 0x447   :  { %v1920_v18 = vpop.trf.xlu2 }
 0x448   :  { %v1855_v20 = vpop.trf.xlu1  ;;  %1993 = vst.msk [vmem:[%s4186_s7 + $0x108] sm:$0xff] %vm1959_vm12, %v1920_v18 }
 0x449   :  { %1968 = vst.msk [vmem:[%s4186_s7 + $0x40] sm:$0xff] %vm1959_vm12, %v1855_v20 }
 0x44f   :  { %v1921_v21 = vpop.trf.xlu2 }
 0x450   :  { %v1856_v23 = vpop.trf.xlu1  ;;  %1994 = vst.msk [vmem:[%s4186_s7 + $0x110] sm:$0xff] %vm1959_vm12, %v1921_v21 }
 0x451   :  { %1969 = vst.msk [vmem:[%s4186_s7 + $0x48] sm:$0xff] %vm1959_vm12, %v1856_v23 }
 0x457   :  { %v1922_v28 = vpop.trf.xlu2 }
 0x458   :  { %v1857_v24 = vpop.trf.xlu1  ;;  %1995 = vst.msk [vmem:[%s4186_s7 + $0x118] sm:$0xff] %vm1959_vm12, %v1922_v28 }
 0x459   :  { %1970 = vst.msk [vmem:[%s4186_s7 + $0x50] sm:$0xff] %vm1959_vm12, %v1857_v24 }
 0x45f   :  { %v1923_v30 = vpop.trf.xlu2 }
 0x460   :  { %v1858_v31 = vpop.trf.xlu1  ;;  %1996 = vst.msk [vmem:[%s4186_s7 + $0x120] sm:$0xff] %vm1959_vm12, %v1923_v30 }
 0x461   :  { %1971 = vst.msk [vmem:[%s4186_s7 + $0x58] sm:$0xff] %vm1959_vm12, %v1858_v31 }
 0x467   :  { %v1924_v32 = vpop.trf.xlu2 }
 0x468   :  { %v1859_v33 = vpop.trf.xlu1  ;;  %1997 = vst.msk [vmem:[%s4186_s7 + $0x128] sm:$0xff] %vm1959_vm12, %v1924_v32 }
 0x469   :  { %1972 = vst.msk [vmem:[%s4186_s7 + $0x60] sm:$0xff] %vm1959_vm12, %v1859_v33 }
 0x46f   :  { %v1925_v36 = vpop.trf.xlu2 }
 0x470   :  { %v1860_v37 = vpop.trf.xlu1  ;;  %1998 = vst.msk [vmem:[%s4186_s7 + $0x130] sm:$0xff] %vm1959_vm12, %v1925_v36 }
 0x471   :  { %1973 = vst.msk [vmem:[%s4186_s7 + $0x68] sm:$0xff] %vm1959_vm12, %v1860_v37 }
 0x477   :  { %v1926_v10 = vpop.trf.xlu2 }
 0x478   :  { %v1861_v16 = vpop.trf.xlu1  ;;  %1999 = vst.msk [vmem:[%s4186_s7 + $0x138] sm:$0xff] %vm1959_vm12, %v1926_v10 }
 0x479   :  { %1974 = vst.msk [vmem:[%s4186_s7 + $0x70] sm:$0xff] %vm1959_vm12, %v1861_v16 }
 0x47f   :  { %v1943_v13 = vpop.trf.xlu2 }
 0x480   :  { %v1862_v25 = vpop.trf.xlu1  ;;  %2000 = vst.msk [vmem:[%s4186_s7 + $0x140] sm:$0xff] %vm1959_vm12, %v1943_v13 }
 0x481   :  { %1975 = vst.msk [vmem:[%s4186_s7 + $0x78] sm:$0xff] %vm1959_vm12, %v1862_v25 }
 0x487   :  { %v1944_v26 = vpop.trf.xlu2 }
 0x488   :  { %v1879_v29 = vpop.trf.xlu1  ;;  %2001 = vst.msk [vmem:[%s4186_s7 + $0x148] sm:$0xff] %vm1959_vm12, %v1944_v26 }
 0x489   :  { %1976 = vst.msk [vmem:[%s4186_s7 + $0x80] sm:$0xff] %vm1959_vm12, %v1879_v29 }
 0x48f   :  { %v1945_v35 = vpop.trf.xlu2 }
 0x490   :  { %v1880_v38 = vpop.trf.xlu1  ;;  %2002 = vst.msk [vmem:[%s4186_s7 + $0x150] sm:$0xff] %vm1959_vm12, %v1945_v35 }
 0x491   :  { %1977 = vst.msk [vmem:[%s4186_s7 + $0x88] sm:$0xff] %vm1959_vm12, %v1880_v38 }
 0x497   :  { %v1946_v39 = vpop.trf.xlu2 }
 0x498   :  { %v1881_v34 = vpop.trf.xlu1  ;;  %2003 = vst.msk [vmem:[%s4186_s7 + $0x158] sm:$0xff] %vm1959_vm12, %v1946_v39 }
 0x499   :  { %1978 = vst.msk [vmem:[%s4186_s7 + $0x90] sm:$0xff] %vm1959_vm12, %v1881_v34 }
 0x49f   :  { %v1947_v40 = vpop.trf.xlu2 }
 0x4a0   :  { %v1882_v41 = vpop.trf.xlu1  ;;  %2004 = vst.msk [vmem:[%s4186_s7 + $0x160] sm:$0xff] %vm1959_vm12, %v1947_v40 }
 0x4a1   :  { %1979 = vst.msk [vmem:[%s4186_s7 + $0x98] sm:$0xff] %vm1959_vm12, %v1882_v41 }
 0x4a7   :  { %v1948_v42 = vpop.trf.xlu2 }
 0x4a8   :  { %v1883_v43 = vpop.trf.xlu1  ;;  %2005 = vst.msk [vmem:[%s4186_s7 + $0x168] sm:$0xff] %vm1959_vm12, %v1948_v42 }
 0x4a9   :  { %1980 = vst.msk [vmem:[%s4186_s7 + $0xa0] sm:$0xff] %vm1959_vm12, %v1883_v43 }
 0x4af   :  { %v1949_v44 = vpop.trf.xlu2 }
 0x4b0   :  { %v1884_v45 = vpop.trf.xlu1  ;;  %2006 = vst.msk [vmem:[%s4186_s7 + $0x170] sm:$0xff] %vm1959_vm12, %v1949_v44 }
 0x4b1   :  { %1981 = vst.msk [vmem:[%s4186_s7 + $0xa8] sm:$0xff] %vm1959_vm12, %v1884_v45 }
 0x4b7   :  { %v1950_v46 = vpop.trf.xlu2 }
 0x4b8   :  { %v1885_v47 = vpop.trf.xlu1  ;;  %2007 = vst.msk [vmem:[%s4186_s7 + $0x178] sm:$0xff] %vm1959_vm12, %v1950_v46 }
 0x4b9   :  { %1982 = vst.msk [vmem:[%s4186_s7 + $0xb0] sm:$0xff] %vm1959_vm12, %v1885_v47 }
 0x4c0   :  { %v1886_v19 = vpop.trf.xlu1 }
 0x4c1   :  { %1983 = vst.msk [vmem:[%s4186_s7 + $0xb8] sm:$0xff] %vm1959_vm12, %v1886_v19 }

</bundles_post_ra>
